<compile_context>
chip_gen: v5e
topology: v5e:2x2
jax: 0.10.0
libtpu: 0.0.40
codegen_flags: <defaults>
</compile_context>

<pallas_src>
import functools

import jax
import jax.numpy as jnp
from jax.experimental import pallas as pl
from jax.experimental.pallas import tpu as pltpu


_IN = 28 * 28     # 784
_H = 512
_NCLS = 10
_N_PAD = 128      # class axis padded 10 -> 128: lane-dense fc3 / softmax / store
_NEG_BIG = -1e30  # bias fill for padded class lanes -> exp() == 0 in softmax


def _round_up(x, m):
    return ((x + m - 1) // m) * m


def _mlp_kernel(x_ref, w1_ref, b1_ref, w2_ref, b2_ref, w3_ref, b3_ref, o_ref):
    # x tile: (TB, 784) f32, cast to bf16 here (saves the wrapper pad/cast pass
    # and >2x of x HBM traffic). Weights: bf16, VMEM-resident across the batch
    # grid (index_maps always return block (0, 0)). Biases: f32, added after
    # the f32 MXU accumulation.
    x = x_ref[...].astype(jnp.bfloat16)

    h1 = jnp.dot(x, w1_ref[...], preferred_element_type=jnp.float32) + b1_ref[...]
    h1 = jnp.maximum(h1, 0.0).astype(jnp.bfloat16)                   # (TB, 512)

    h2 = jnp.dot(h1, w2_ref[...], preferred_element_type=jnp.float32) + b2_ref[...]
    h2 = jnp.maximum(h2, 0.0).astype(jnp.bfloat16)                   # (TB, 512)

    logits = jnp.dot(h2, w3_ref[...], preferred_element_type=jnp.float32) + b3_ref[...]

    # Softmax over the (padded) class axis, matching F.softmax(..., dim=1).
    # Padded lanes carry a -1e30 bias, so exp underflows to 0 and does not
    # contribute to the denominator. Exact divide (NOT approx reciprocal) so
    # each row sums to 1 within f32 rounding.
    m = jnp.max(logits, axis=-1, keepdims=True)
    e = jnp.exp(logits - m)
    denom = jnp.sum(e, axis=-1, keepdims=True)
    o_ref[...] = (e / denom).astype(o_ref.dtype)


def prepare_params(w1, b1, w2, b2, w3, b3):
    """One-time packing of the (in, out)-layout params for the kernel.

    Casts weights to bf16 and pads the fc3 class axis 10 -> 128 (zero weight
    columns, -1e30 bias columns). Call once; reuse for every forward.
    """
    w1p = w1.astype(jnp.bfloat16)                                    # (784, 512)
    w2p = w2.astype(jnp.bfloat16)                                    # (512, 512)
    w3p = jnp.pad(w3, ((0, 0), (0, _N_PAD - _NCLS))).astype(jnp.bfloat16)  # (512, 128)
    b1r = b1.reshape(1, _H).astype(jnp.float32)
    b2r = b2.reshape(1, _H).astype(jnp.float32)
    b3p = jnp.pad(b3.reshape(1, _NCLS).astype(jnp.float32),
                  ((0, 0), (0, _N_PAD - _NCLS)), constant_values=_NEG_BIG)
    return (w1p, b1r, w2p, b2r, w3p, b3p)


def _pick_tile(B, tb):
    # Batch tile: multiple of 8 sublanes; >= 2 tiles whenever B > 16 so v7x's
    # two TensorCores both get work; capped at tb (default 512, multiple of
    # 256) and at ~ceil(B/2) to bound batch-padding waste.
    if B <= 16:
        return max(8, _round_up(B, 8))
    half = (B + 1) // 2
    return min(tb, _round_up(half, 8))


@functools.partial(jax.jit, static_argnames=("tb",))
def minist_net_forward(x, params, *, tb=512):
    """Forward pass of ministNet. x: (B, 1, 28, 28) or (B, 784)."""
    w1p, b1r, w2p, b2r, w3p, b3p = params

    x2d = x.reshape(-1, _IN).astype(jnp.float32)                     # x.view(-1, 784)
    B = x2d.shape[0]

    TB = _pick_tile(B, tb)
    Bp = _round_up(B, TB)
    xp = jnp.pad(x2d, ((0, Bp - B), (0, 0)))                         # batch pad only

    grid = (Bp // TB,)

    cost = pl.CostEstimate(
        flops=2 * Bp * (_IN * _H + _H * _H + _H * _N_PAD),
        transcendentals=Bp * _N_PAD,
        bytes_accessed=(4 * xp.size                                   # f32 x
                        + 2 * (w1p.size + w2p.size + w3p.size)        # bf16 weights
                        + 4 * (b1r.size + b2r.size + b3p.size)        # f32 biases
                        + 4 * Bp * _N_PAD),                           # f32 out
    )

    # Weights/biases: same block for every grid step -> loaded once, kept
    # VMEM-resident. (Default double-buffering of these blocks adds ~1.5 MiB,
    # negligible vs the 32 MiB limit, so pl.Buffered(1) is not forced.)
    keep = lambda shape: pl.BlockSpec(shape, lambda i: (0, 0))

    out = pl.pallas_call(
        _mlp_kernel,
        out_shape=jax.ShapeDtypeStruct((Bp, _N_PAD), jnp.float32),
        grid=grid,
        in_specs=[
            pl.BlockSpec((TB, _IN), lambda i: (i, 0)),   # x: tiled over batch
            keep(w1p.shape),
            keep(b1r.shape),
            keep(w2p.shape),
            keep(b2r.shape),
            keep(w3p.shape),
            keep(b3p.shape),
        ],
        out_specs=pl.BlockSpec((TB, _N_PAD), lambda i: (i, 0)),
        compiler_params=pltpu.CompilerParams(
            dimension_semantics=("parallel",),   # megacore split on v7x
            vmem_limit_bytes=32 << 20,           # actual footprint is a few MiB
        ),
        cost_estimate=cost,
    )(xp, w1p, b1r, w2p, b2r, w3p, b3p)

    # Drop batch padding and the 118 padded class columns.
    return out[:B, :_NCLS]


def _ref_forward(x, w1, b1, w2, b2, w3, b3):
    # Pure-JAX reference following the same bf16-weight / f32-accumulate path.
    xr = x.reshape(-1, _IN).astype(jnp.bfloat16)
    h = jnp.dot(xr, w1.astype(jnp.bfloat16), preferred_element_type=jnp.float32) + b1
    h = jnp.maximum(h, 0.0).astype(jnp.bfloat16)
    h = jnp.dot(h, w2.astype(jnp.bfloat16), preferred_element_type=jnp.float32) + b2
    h = jnp.maximum(h, 0.0).astype(jnp.bfloat16)
    logits = jnp.dot(h, w3.astype(jnp.bfloat16), preferred_element_type=jnp.float32) + b3
    return jax.nn.softmax(logits, axis=1)


def _init_linear(key, fan_in, fan_out):
    # Deterministic init mimicking torch.nn.Linear (uniform +/- 1/sqrt(fan_in)),
    # stored as (in, out).
    kw, kb = jax.random.split(key)
    bound = 1.0 / jnp.sqrt(jnp.float32(fan_in))
    w = jax.random.uniform(kw, (fan_in, fan_out), jnp.float32, -bound, bound)
    b = jax.random.uniform(kb, (fan_out,), jnp.float32, -bound, bound)
    return w, b


if __name__ == "__main__":
    key = jax.random.PRNGKey(0)
    kx, k1, k2, k3 = jax.random.split(key, 4)

    w1, b1 = _init_linear(k1, _IN, _H)
    w2, b2 = _init_linear(k2, _H, _H)
    w3, b3 = _init_linear(k3, _H, _NCLS)

    # Pack/cast weights once (bf16, class axis padded); reused across calls.
    params = prepare_params(w1, b1, w2, b2, w3, b3)

    # Small-batch case (B=2): single 8-row tile, single grid step.
    B = 2
    x = jax.random.normal(kx, (B, 1, 28, 28), jnp.float32)
    out = jax.block_until_ready(minist_net_forward(x, params))
    assert out.shape == (B, _NCLS)
    assert jnp.allclose(jnp.sum(out, axis=1), 1.0, atol=1e-4)
    assert jnp.allclose(out, _ref_forward(x, w1, b1, w2, b2, w3, b3), atol=2e-3)

    # Mid-size batch (B=20): two 16-row tiles + batch padding, exercises the
    # parallel batch grid (both TCs on v7x) and VMEM-resident weights.
    B2 = 20
    x2 = jax.random.normal(kx, (B2, 1, 28, 28), jnp.float32)
    out2 = jax.block_until_ready(minist_net_forward(x2, params))
    assert out2.shape == (B2, _NCLS)
    assert jnp.allclose(jnp.sum(out2, axis=1), 1.0, atol=1e-4)
    assert jnp.allclose(out2, _ref_forward(x2, w1, b1, w2, b2, w3, b3), atol=2e-3)

    print("KERNEL_OK")
</pallas_src>

<mosaic_0001>
module attributes {stable_mosaic.version = 11 : i64} {
  func.func @_mlp_kernel(%arg0: i32, %arg1: memref<8x784xf32, #tpu.memory_space<vmem>>, %arg2: memref<784x512xbf16, #tpu.memory_space<vmem>>, %arg3: memref<1x512xf32, #tpu.memory_space<vmem>>, %arg4: memref<512x512xbf16, #tpu.memory_space<vmem>>, %arg5: memref<1x512xf32, #tpu.memory_space<vmem>>, %arg6: memref<512x128xbf16, #tpu.memory_space<vmem>>, %arg7: memref<1x128xf32, #tpu.memory_space<vmem>>, %arg8: memref<8x128xf32, #tpu.memory_space<vmem>>) attributes {dimension_semantics = [#tpu.dimension_semantics<parallel>], iteration_bounds = array<i64: 1>, scalar_prefetch = 0 : i64, scratch_operands = 0 : i64, tpu.core_type = #tpu.core_type<tc>, window_params = [{transform_indices = @transform_0, window_bounds = array<i64: 8, 784>}, {pipeline_mode = #tpu.pipeline_mode<synchronous>, transform_indices = @transform_1, window_bounds = array<i64: 784, 512>}, {pipeline_mode = #tpu.pipeline_mode<synchronous>, transform_indices = @transform_2, window_bounds = array<i64: 1, 512>}, {pipeline_mode = #tpu.pipeline_mode<synchronous>, transform_indices = @transform_3, window_bounds = array<i64: 512, 512>}, {pipeline_mode = #tpu.pipeline_mode<synchronous>, transform_indices = @transform_4, window_bounds = array<i64: 1, 512>}, {pipeline_mode = #tpu.pipeline_mode<synchronous>, transform_indices = @transform_5, window_bounds = array<i64: 512, 128>}, {pipeline_mode = #tpu.pipeline_mode<synchronous>, transform_indices = @transform_6, window_bounds = array<i64: 1, 128>}, {transform_indices = @transform_7, window_bounds = array<i64: 8, 128>}]} {
    %c0 = arith.constant 0 : index
    %c0_0 = arith.constant 0 : index
    %0 = vector.load %arg1[%c0, %c0_0] : memref<8x784xf32, #tpu.memory_space<vmem>>, vector<8x784xf32>
    %1 = arith.truncf %0 : vector<8x784xf32> to vector<8x784xbf16>
    %c0_1 = arith.constant 0 : index
    %c0_2 = arith.constant 0 : index
    %2 = vector.load %arg2[%c0_1, %c0_2] : memref<784x512xbf16, #tpu.memory_space<vmem>>, vector<784x512xbf16>
    %cst = arith.constant dense<0.000000e+00> : vector<8x512xf32>
    %3 = tpu.matmul %1, %2, %cst {dimension_numbers = #tpu.dot_dimension_numbers<[1], [0], [0], [1], [0, 0, 1, 1], [], []>} : vector<8x784xbf16>, vector<784x512xbf16>, vector<8x512xf32> -> vector<8x512xf32>
    %c0_3 = arith.constant 0 : index
    %c0_4 = arith.constant 0 : index
    %4 = vector.load %arg3[%c0_3, %c0_4] : memref<1x512xf32, #tpu.memory_space<vmem>>, vector<1x512xf32>
    %5 = vector.broadcast %4 : vector<1x512xf32> to vector<8x512xf32>
    %6 = arith.addf %3, %5 : vector<8x512xf32>
    %cst_5 = arith.constant 0.000000e+00 : f32
    %7 = vector.broadcast %cst_5 : f32 to vector<8x512xf32>
    %8 = arith.maximumf %6, %7 : vector<8x512xf32>
    %9 = arith.truncf %8 : vector<8x512xf32> to vector<8x512xbf16>
    %c0_6 = arith.constant 0 : index
    %c0_7 = arith.constant 0 : index
    %10 = vector.load %arg4[%c0_6, %c0_7] : memref<512x512xbf16, #tpu.memory_space<vmem>>, vector<512x512xbf16>
    %cst_8 = arith.constant dense<0.000000e+00> : vector<8x512xf32>
    %11 = tpu.matmul %9, %10, %cst_8 {dimension_numbers = #tpu.dot_dimension_numbers<[1], [0], [0], [1], [0, 0, 1, 1], [], []>} : vector<8x512xbf16>, vector<512x512xbf16>, vector<8x512xf32> -> vector<8x512xf32>
    %c0_9 = arith.constant 0 : index
    %c0_10 = arith.constant 0 : index
    %12 = vector.load %arg5[%c0_9, %c0_10] : memref<1x512xf32, #tpu.memory_space<vmem>>, vector<1x512xf32>
    %13 = vector.broadcast %12 : vector<1x512xf32> to vector<8x512xf32>
    %14 = arith.addf %11, %13 : vector<8x512xf32>
    %cst_11 = arith.constant 0.000000e+00 : f32
    %15 = vector.broadcast %cst_11 : f32 to vector<8x512xf32>
    %16 = arith.maximumf %14, %15 : vector<8x512xf32>
    %17 = arith.truncf %16 : vector<8x512xf32> to vector<8x512xbf16>
    %c0_12 = arith.constant 0 : index
    %c0_13 = arith.constant 0 : index
    %18 = vector.load %arg6[%c0_12, %c0_13] : memref<512x128xbf16, #tpu.memory_space<vmem>>, vector<512x128xbf16>
    %cst_14 = arith.constant dense<0.000000e+00> : vector<8x128xf32>
    %19 = tpu.matmul %17, %18, %cst_14 {dimension_numbers = #tpu.dot_dimension_numbers<[1], [0], [0], [1], [0, 0, 1, 1], [], []>} : vector<8x512xbf16>, vector<512x128xbf16>, vector<8x128xf32> -> vector<8x128xf32>
    %c0_15 = arith.constant 0 : index
    %c0_16 = arith.constant 0 : index
    %20 = vector.load %arg7[%c0_15, %c0_16] : memref<1x128xf32, #tpu.memory_space<vmem>>, vector<1x128xf32>
    %21 = vector.broadcast %20 : vector<1x128xf32> to vector<8x128xf32>
    %22 = arith.addf %19, %21 : vector<8x128xf32>
    %cst_17 = arith.constant dense<0xFF800000> : vector<8xf32>
    %23 = vector.multi_reduction <maximumf>, %22, %cst_17 [1] : vector<8x128xf32> to vector<8xf32>
    %24 = vector.shape_cast %23 : vector<8xf32> to vector<8x1xf32>
    %25 = vector.broadcast %24 : vector<8x1xf32> to vector<8x128xf32>
    %26 = arith.subf %22, %25 : vector<8x128xf32>
    %27 = math.exp %26 : vector<8x128xf32>
    %cst_18 = arith.constant dense<0.000000e+00> : vector<8xf32>
    %28 = vector.multi_reduction <add>, %27, %cst_18 [1] : vector<8x128xf32> to vector<8xf32>
    %29 = vector.shape_cast %28 : vector<8xf32> to vector<8x1xf32>
    %30 = vector.broadcast %29 : vector<8x1xf32> to vector<8x128xf32>
    %31 = arith.divf %27, %30 : vector<8x128xf32>
    %c0_19 = arith.constant 0 : index
    %c0_20 = arith.constant 0 : index
    %32 = vector.load %arg8[%c0_19, %c0_20] : memref<8x128xf32, #tpu.memory_space<vmem>>, vector<8x128xf32>
    tpu.vector_store %arg8[%c0_19, %c0_20], %31 {strides = array<i32>} : memref<8x128xf32, #tpu.memory_space<vmem>>, vector<8x128xf32>,
    return
  }
  func.func @transform_0(%arg0: i32) -> (i32, i32) {
    %c0_i32 = arith.constant 0 : i32
    %c0_i32_0 = arith.constant 0 : i32
    return %arg0, %c0_i32 : i32, i32
  }
  func.func @transform_1(%arg0: i32) -> (i32, i32) {
    %c0_i32 = arith.constant 0 : i32
    %c0_i32_0 = arith.constant 0 : i32
    %c0_i32_1 = arith.constant 0 : i32
    return %c0_i32, %c0_i32_0 : i32, i32
  }
  func.func @transform_2(%arg0: i32) -> (i32, i32) {
    %c0_i32 = arith.constant 0 : i32
    %c0_i32_0 = arith.constant 0 : i32
    %c0_i32_1 = arith.constant 0 : i32
    return %c0_i32, %c0_i32_0 : i32, i32
  }
  func.func @transform_3(%arg0: i32) -> (i32, i32) {
    %c0_i32 = arith.constant 0 : i32
    %c0_i32_0 = arith.constant 0 : i32
    %c0_i32_1 = arith.constant 0 : i32
    return %c0_i32, %c0_i32_0 : i32, i32
  }
  func.func @transform_4(%arg0: i32) -> (i32, i32) {
    %c0_i32 = arith.constant 0 : i32
    %c0_i32_0 = arith.constant 0 : i32
    %c0_i32_1 = arith.constant 0 : i32
    return %c0_i32, %c0_i32_0 : i32, i32
  }
  func.func @transform_5(%arg0: i32) -> (i32, i32) {
    %c0_i32 = arith.constant 0 : i32
    %c0_i32_0 = arith.constant 0 : i32
    %c0_i32_1 = arith.constant 0 : i32
    return %c0_i32, %c0_i32_0 : i32, i32
  }
  func.func @transform_6(%arg0: i32) -> (i32, i32) {
    %c0_i32 = arith.constant 0 : i32
    %c0_i32_0 = arith.constant 0 : i32
    %c0_i32_1 = arith.constant 0 : i32
    return %c0_i32, %c0_i32_0 : i32, i32
  }
  func.func @transform_7(%arg0: i32) -> (i32, i32) {
    %c0_i32 = arith.constant 0 : i32
    %c0_i32_0 = arith.constant 0 : i32
    return %arg0, %c0_i32 : i32, i32
  }
}

</mosaic_0001>

<bundles_post_ra>
// kernel: minist_net_forward.1
= control target key start
LH: loop header
LB: loop body
LE: loop exit
PB: predicated region body
PF: predicated region fallthrough
CT: control target
= control target key end

     0   :  { %12 = vsyncpa [#allocation3], 0  ;;  %s5127_s0 = inlined_call_operand.vmem [shape: f32[8,784], index: 0, kind: input, shape index: {}]   ;;  %s5128_s1 = inlined_call_operand.hbm [shape: bf16[784,512], index: 1, kind: input, shape index: {}]   ;;  %s5129_s2 = inlined_call_operand.vmem [shape: f32[1,512], index: 2, kind: input, shape index: {}]   ;;  %s5130_s3 = inlined_call_operand.hbm [shape: bf16[512,512], index: 3, kind: input, shape index: {}]   ;;  %s5131_s4 = inlined_call_operand.vmem [shape: f32[1,512], index: 4, kind: input, shape index: {}]   ;;  %s5132_s5 = inlined_call_operand.vmem [shape: bf16[512,128], index: 5, kind: input, shape index: {}]   ;;  %s5133_s6 = inlined_call_operand.vmem [shape: f32[1,128], index: 6, kind: input, shape index: {}]   ;;  %s5134_s7 = inlined_call_operand.vmem [shape: f32[8,128], index: 7, kind: output, shape index: {}]  }
   0x1   :  { %s20_s26 = sshll.u32 %s5128_s1, 4  ;;  %s21_s26 = int_to_ptr.hbm [resolvable:$true] %s20_s26 }
   0x2   :  { %13 = vsyncpa [#allocation5], 0  ;;  %s4815_s27 = smov [#allocation2]   ;;  %s35_s8 = sshll.u32 %s5130_s3, 4  ;;  %s36_s8 = int_to_ptr.hbm [resolvable:$true] %s35_s8 }
   0x3   :  { %s22_s28 = sshll.u32 %s4815_s27, 4  ;;  %s4816_s9 = smov 256   ;;  %s23_s28 = int_to_ptr.vmem [resolvable:$true] %s22_s28 }
   0x4   :  { %s4817_s10 = smov 16   ;;  %s4818_s11 = smov [#allocation4]  }
   0x5   :  { %28 = dma.hbm_to_vmem [thread:$0]  %s21_s26, 25088, %s23_s28, [#allocation3], %s4816_s9, %s4816_s9, %s4817_s10  }
   0x6   :  { %s37_s12 = sshll.u32 %s4818_s11, 4  ;;  %s38_s12 = int_to_ptr.vmem [resolvable:$true] %s37_s12 }
   0x7   :  { %43 = dma.hbm_to_vmem [thread:$0]  %s36_s8, 16384, %s38_s12, [#allocation5], %s4816_s9, %s4816_s9, %s4817_s10  }
   0x8   :  { %4811 = dma.done.wait [#allocation3], 25088  }
   0x9   :  { %4812 = vsyncadd [#allocation3], 4294942208 }
   0xa   :  { %4813 = dma.done.wait [#allocation5], 16384  }
   0xb   :  { %4814 = vsyncadd [#allocation5], 4294950912  ;;  %v3084_v0 = vld [vmem:[#allocation2 + $0xe0] sm:$0xf]  ;;  %v4428_v1 = vld [vmem:[#allocation2 + $0xec] sm:$0xf0] }
   0xc   :  { %v3212_v2 = vld [vmem:[#allocation2 + $0x1e0] sm:$0xf]  ;;  %v3085_v3 = vor.u32 %v4428_v1, %v3084_v0  ;;  %v4460_v4 = vld [vmem:[#allocation2 + $0x1ec] sm:$0xf0]  ;;  %vm1259_vm0 = vcmask 130048  }
   0xd   :  { %v3340_v5 = vld [vmem:[#allocation2 + $0x2e0] sm:$0xf]  ;;  %v4492_v6 = vld [vmem:[#allocation2 + $0x2ec] sm:$0xf0]  ;;  %v3213_v7 = vor.u32 %v4460_v4, %v3212_v2 }
   0xe   :  { %v3341_v8 = vor.u32 %v4492_v6, %v3340_v5  ;;  %v3468_v9 = vld [vmem:[#allocation2 + $0x3e0] sm:$0xf]  ;;  %v4524_v10 = vld [vmem:[#allocation2 + $0x3ec] sm:$0xf0]  ;;  %1263 = vmatpush.bf16.msra.mxu0 %v3085_v3 }
   0xf   :  { %v3068_v11 = vld [vmem:[#allocation2 + $0xc0] sm:$0xf]  ;;  %v3469_v12 = vor.u32 %v4524_v10, %v3468_v9  ;;  %v4424_v13 = vld [vmem:[#allocation2 + $0xcc] sm:$0xf0]  ;;  %1276 = vmatpush.bf16.msra.mxu1 %v3213_v7 }
  0x10   :  { %v3196_v14 = vld [vmem:[#allocation2 + $0x1c0] sm:$0xf]  ;;  %v4456_v15 = vld [vmem:[#allocation2 + $0x1cc] sm:$0xf0]  ;;  %1289 = vmatpush.bf16.msra.mxu2 %v3341_v8  ;;  %v3069_v16 = vor.u32 %v4424_v13, %v3068_v11 }
  0x11   :  { %v3197_v17 = vor.u32 %v4456_v15, %v3196_v14  ;;  %v3324_v18 = vld [vmem:[#allocation2 + $0x2c0] sm:$0xf]  ;;  %v4488_v19 = vld [vmem:[#allocation2 + $0x2cc] sm:$0xf0]  ;;  %1302 = vmatpush.bf16.msra.mxu3 %v3469_v12 }
  0x12   :  { %v3452_v20 = vld [vmem:[#allocation2 + $0x3c0] sm:$0xf]  ;;  %v3325_v21 = vor.u32 %v4488_v19, %v3324_v18  ;;  %v4520_v22 = vld [vmem:[#allocation2 + $0x3cc] sm:$0xf0]  ;;  %1264 = vmatpush.bf16.msra.mxu0 %v3069_v16 }
  0x13   :  { %v3052_v23 = vld [vmem:[#allocation2 + $0xa0] sm:$0xf]  ;;  %v4420_v24 = vld [vmem:[#allocation2 + $0xac] sm:$0xf0]  ;;  %v3453_v25 = vor.u32 %v4520_v22, %v3452_v20  ;;  %1277 = vmatpush.bf16.msra.mxu1 %v3197_v17 }
  0x14   :  { %v3180_v26 = vld [vmem:[#allocation2 + $0x1a0] sm:$0xf]  ;;  %v4452_v27 = vld [vmem:[#allocation2 + $0x1ac] sm:$0xf0]  ;;  %v3053_v29 = vor.u32 %v4420_v24, %v3052_v23  ;;  %1290 = vmatpush.bf16.msra.mxu2 %v3325_v21 }
  0x15   :  { %v3308_v28 = vld [vmem:[#allocation2 + $0x2a0] sm:$0xf]  ;;  %v4484_v30 = vld [vmem:[#allocation2 + $0x2ac] sm:$0xf0]  ;;  %v3181_v33 = vor.u32 %v4452_v27, %v3180_v26  ;;  %1303 = vmatpush.bf16.msra.mxu3 %v3453_v25 }
  0x16   :  { %v3436_v31 = vld [vmem:[#allocation2 + $0x3a0] sm:$0xf]  ;;  %v4516_v32 = vld [vmem:[#allocation2 + $0x3ac] sm:$0xf0]  ;;  %v3309_v34 = vor.u32 %v4484_v30, %v3308_v28  ;;  %1265 = vmatpush.bf16.msra.mxu0 %v3053_v29 }
  0x17   :  { %v3036_v35 = vld [vmem:[#allocation2 + $0x80] sm:$0xf]  ;;  %v4416_v36 = vld [vmem:[#allocation2 + $0x8c] sm:$0xf0]  ;;  %v3437_v38 = vor.u32 %v4516_v32, %v3436_v31  ;;  %1278 = vmatpush.bf16.msra.mxu1 %v3181_v33  ;;  %v4426_v33 = vld [vmem:[#allocation2 + $0xe4] sm:$0xf] }
  0x18   :  { %v3164_v37 = vld [vmem:[#allocation2 + $0x180] sm:$0xf]  ;;  %v4448_v39 = vld [vmem:[#allocation2 + $0x18c] sm:$0xf0]  ;;  %v3037_v44 = vor.u32 %v4416_v36, %v3036_v35  ;;  %1291 = vmatpush.bf16.msra.mxu2 %v3309_v34  ;;  %v3086_v34 = vld [vmem:[#allocation2 + $0xf0] sm:$0xf0] }
  0x19   :  { %v3292_v40 = vld [vmem:[#allocation2 + $0x280] sm:$0xf]  ;;  %v4480_v41 = vld [vmem:[#allocation2 + $0x28c] sm:$0xf0]  ;;  %v3165_v45 = vor.u32 %v4448_v39, %v3164_v37  ;;  %1304 = vmatpush.bf16.msra.mxu3 %v3437_v38 }
  0x1a   :  { %v3420_v42 = vld [vmem:[#allocation2 + $0x380] sm:$0xf]  ;;  %v4512_v43 = vld [vmem:[#allocation2 + $0x38c] sm:$0xf0]  ;;  %v3293_v46 = vor.u32 %v4480_v41, %v3292_v40  ;;  %1266 = vmatpush.bf16.msra.mxu0 %v3037_v44  ;;  %v3214_v44 = vld [vmem:[#allocation2 + $0x1f0] sm:$0xf0] }
  0x1b   :  { %v3020_v47 = vld [vmem:[#allocation2 + $0x60] sm:$0xf]  ;;  %v4412_v48 = vld [vmem:[#allocation2 + $0x6c] sm:$0xf0]  ;;  %v3421_v50 = vor.u32 %v4512_v43, %v3420_v42  ;;  %1279 = vmatpush.bf16.msra.mxu1 %v3165_v45  ;;  %v4458_v43 = vld [vmem:[#allocation2 + $0x1e4] sm:$0xf] }
  0x1c   :  { %v3148_v49 = vld [vmem:[#allocation2 + $0x160] sm:$0xf]  ;;  %v4444_v51 = vld [vmem:[#allocation2 + $0x16c] sm:$0xf0]  ;;  %v3021_v56 = vor.u32 %v4412_v48, %v3020_v47  ;;  %1292 = vmatpush.bf16.msra.mxu2 %v3293_v46  ;;  %v62_v45 = vld [vmem:[%s5127_s0 + $0x18] sm:$0xff]  ;;  %v3089_v47 = vor.u32 %v4426_v33, %v3086_v34 }
  0x1d   :  { %v3276_v52 = vld [vmem:[#allocation2 + $0x260] sm:$0xf]  ;;  %v4476_v53 = vld [vmem:[#allocation2 + $0x26c] sm:$0xf0]  ;;  %v3149_v57 = vor.u32 %v4444_v51, %v3148_v49  ;;  %1305 = vmatpush.bf16.msra.mxu3 %v3421_v50 }
  0x1e   :  { %v3404_v54 = vld [vmem:[#allocation2 + $0x360] sm:$0xf]  ;;  %v4508_v55 = vld [vmem:[#allocation2 + $0x36c] sm:$0xf0]  ;;  %v3277_v58 = vor.u32 %v4476_v53, %v3276_v52  ;;  %1267 = vmatpush.bf16.msra.mxu0 %v3021_v56  ;;  %v4422_v53 = vld [vmem:[#allocation2 + $0xc4] sm:$0xf] }
  0x1f   :  { %v3004_v59 = vld [vmem:[#allocation2 + $0x40] sm:$0xf]  ;;  %v4408_v60 = vld [vmem:[#allocation2 + $0x4c] sm:$0xf0]  ;;  %v3405_v62 = vor.u32 %v4508_v55, %v3404_v54  ;;  %1280 = vmatpush.bf16.msra.mxu1 %v3149_v57  ;;  %v3070_v54 = vld [vmem:[#allocation2 + $0xd0] sm:$0xf0]  ;;  %v4878_v57 = vpack.c.bf16 %v62_v45, %v62_v45 }
  0x20   :  { %v3132_v61 = vld [vmem:[#allocation2 + $0x140] sm:$0xf]  ;;  %v4440_v63 = vld [vmem:[#allocation2 + $0x14c] sm:$0xf0]  ;;  %v3005_v4 = vor.u32 %v4408_v60, %v3004_v59  ;;  %1293 = vmatpush.bf16.msra.mxu2 %v3277_v58  ;;  %v60_v58 = vld [vmem:[%s5127_s0 + $0x8] sm:$0xff]  ;;  %v3217_v59 = vor.u32 %v4458_v43, %v3214_v44 }
  0x21   :  { %v3260_v0 = vld [vmem:[#allocation2 + $0x240] sm:$0xf]  ;;  %v4472_v1 = vld [vmem:[#allocation2 + $0x24c] sm:$0xf0]  ;;  %v3133_v5 = vor.u32 %v4440_v63, %v3132_v61  ;;  %1306 = vmatpush.bf16.msra.mxu3 %v3405_v62  ;;  %v4454_v61 = vld [vmem:[#allocation2 + $0x1c4] sm:$0xf] }
  0x22   :  { %v3388_v2 = vld [vmem:[#allocation2 + $0x340] sm:$0xf]  ;;  %v4504_v3 = vld [vmem:[#allocation2 + $0x34c] sm:$0xf0]  ;;  %v3261_v6 = vor.u32 %v4472_v1, %v3260_v0  ;;  %1268 = vmatpush.bf16.msra.mxu0 %v3005_v4  ;;  %v3198_v62 = vld [vmem:[#allocation2 + $0x1d0] sm:$0xf0]  ;;  %v3073_v0 = vor.u32 %v4422_v53, %v3070_v54 }
  0x23   :  { %v2988_v7 = vld [vmem:[#allocation2 + $0x20] sm:$0xf]  ;;  %v4404_v8 = vld [vmem:[#allocation2 + $0x2c] sm:$0xf0]  ;;  %v3389_v10 = vor.u32 %v4504_v3, %v3388_v2  ;;  %1281 = vmatpush.bf16.msra.mxu1 %v3133_v5  ;;  %v4418_v5 = vld [vmem:[#allocation2 + $0xa4] sm:$0xf] }
  0x24   :  { %v3116_v9 = vld [vmem:[#allocation2 + $0x120] sm:$0xf]  ;;  %v4436_v11 = vld [vmem:[#allocation2 + $0x12c] sm:$0xf0]  ;;  %v2989_v16 = vor.u32 %v4404_v8, %v2988_v7  ;;  %1294 = vmatpush.bf16.msra.mxu2 %v3261_v6  ;;  %v3054_v6 = vld [vmem:[#allocation2 + $0xb0] sm:$0xf0]  ;;  %v4885_v7 = vpack.c.bf16 %v60_v58, %v60_v58  ;;  %v3201_v8 = vor.u32 %v4454_v61, %v3198_v62 }
  0x25   :  { %v3244_v12 = vld [vmem:[#allocation2 + $0x220] sm:$0xf]  ;;  %v4468_v13 = vld [vmem:[#allocation2 + $0x22c] sm:$0xf0]  ;;  %v3117_v20 = vor.u32 %v4436_v11, %v3116_v9  ;;  %1307 = vmatpush.bf16.msra.mxu3 %v3389_v10  ;;  %v4450_v10 = vld [vmem:[#allocation2 + $0x1a4] sm:$0xf] }
  0x26   :  { %v3372_v14 = vld [vmem:[#allocation2 + $0x320] sm:$0xf]  ;;  %v4500_v15 = vld [vmem:[#allocation2 + $0x32c] sm:$0xf0]  ;;  %v3245_v21 = vor.u32 %v4468_v13, %v3244_v12  ;;  %1269 = vmatpush.bf16.msra.mxu0 %v2989_v16  ;;  %v3182_v11 = vld [vmem:[#allocation2 + $0x1b0] sm:$0xf0]  ;;  %v3057_v13 = vor.u32 %v4418_v5, %v3054_v6 }
  0x27   :  { %v2972_v17 = vld [vmem:[#allocation2] sm:$0xf]  ;;  %v4400_v18 = vld [vmem:[#allocation2 + $0xc] sm:$0xf0]  ;;  %v3373_v25 = vor.u32 %v4500_v15, %v3372_v14  ;;  %1282 = vmatpush.bf16.msra.mxu1 %v3117_v20  ;;  %v3185_v20 = vor.u32 %v4450_v10, %v3182_v11  ;;  %v4406_v43 = vld [vmem:[#allocation2 + $0x44] sm:$0xf] }
  0x28   :  { %v3100_v19 = vld [vmem:[#allocation2 + $0x100] sm:$0xf]  ;;  %v4432_v22 = vld [vmem:[#allocation2 + $0x10c] sm:$0xf0]  ;;  %v2973_v32 = vor.u32 %v4400_v18, %v2972_v17  ;;  %1295 = vmatpush.bf16.msra.mxu2 %v3245_v21  ;;  %v4414_v18 = vld [vmem:[#allocation2 + $0x84] sm:$0xf] }
  0x29   :  { %v3228_v23 = vld [vmem:[#allocation2 + $0x200] sm:$0xf]  ;;  %v4464_v24 = vld [vmem:[#allocation2 + $0x20c] sm:$0xf0]  ;;  %v3101_v36 = vor.u32 %v4432_v22, %v3100_v19  ;;  %1308 = vmatpush.bf16.msra.mxu3 %v3373_v25  ;;  %v3038_v19 = vld [vmem:[#allocation2 + $0x90] sm:$0xf0] }
  0x2a   :  { %v3356_v26 = vld [vmem:[#allocation2 + $0x300] sm:$0xf]  ;;  %v4496_v27 = vld [vmem:[#allocation2 + $0x30c] sm:$0xf0]  ;;  %v3229_v37 = vor.u32 %v4464_v24, %v3228_v23  ;;  %1270 = vmatpush.bf16.msra.mxu0 %v2973_v32  ;;  %v4446_v22 = vld [vmem:[#allocation2 + $0x184] sm:$0xf]  ;;  %v3041_v25 = vor.u32 %v4414_v18, %v3038_v19 }
  0x2b   :  { %v3596_v28 = vld [vmem:[#allocation2 + $0x4e0] sm:$0xf]  ;;  %v4556_v29 = vld [vmem:[#allocation2 + $0x4ec] sm:$0xf0]  ;;  %v3357_v41 = vor.u32 %v4496_v27, %v3356_v26  ;;  %1283 = vmatpush.bf16.msra.mxu1 %v3101_v36  ;;  %v3166_v23 = vld [vmem:[#allocation2 + $0x190] sm:$0xf0] }
  0x2c   :  { %v3724_v30 = vld [vmem:[#allocation2 + $0x5e0] sm:$0xf]  ;;  %v4588_v31 = vld [vmem:[#allocation2 + $0x5ec] sm:$0xf0]  ;;  %v3597_v42 = vor.u32 %v4556_v29, %v3596_v28  ;;  %1296 = vmatpush.bf16.msra.mxu2 %v3229_v37  ;;  %v3169_v33 = vor.u32 %v4446_v22, %v3166_v23  ;;  %v3150_v36 = vld [vmem:[#allocation2 + $0x170] sm:$0xf0] }
  0x2d   :  { %v61_v35 = vld [vmem:[%s5127_s0 + $0x10] sm:$0xff]  ;;  %v3740_v38 = vld [vmem:[#allocation2 + $0x600] sm:$0xf]  ;;  %v3725_v46 = vor.u32 %v4588_v31, %v3724_v30  ;;  %1309 = vmatpush.bf16.msra.mxu3 %v3357_v41  ;;  %v4410_v30 = vld [vmem:[#allocation2 + $0x64] sm:$0xf] }
  0x2e   :  { %v4592_v39 = vld [vmem:[#allocation2 + $0x60c] sm:$0xf0]  ;;  %v59_v40 = vld [vmem:[%s5127_s0] sm:$0xff]  ;;  %v4874_v51 = vpack.c.bf16 %v61_v35, %v61_v35  ;;  %1315 = vmatpush.bf16.msrb.mxu0 %v3597_v42  ;;  %1284 = vmatmul.bf16.vlgmr.msra.gmra.mxu1 %v4885_v7  ;;  %v3022_v31 = vld [vmem:[#allocation2 + $0x70] sm:$0xf0] }
  0x2f   :  { %v3580_v48 = vld [vmem:[#allocation2 + $0x4c0] sm:$0xf]  ;;  %v4552_v49 = vld [vmem:[#allocation2 + $0x4cc] sm:$0xf0]  ;;  %v4876_v55 = vpack.c.bf16 %v59_v40, %v59_v40  ;;  %v3741_v56 = vor.u32 %v4592_v39, %v3740_v38  ;;  %1328 = vmatpush.bf16.msrb.mxu1 %v3725_v46  ;;  %v4442_v35 = vld [vmem:[#allocation2 + $0x164] sm:$0xf]  ;;  %v3025_v38 = vor.u32 %v4410_v30, %v3022_v31 }
  0x30   :  { %v3708_v50 = vld [vmem:[#allocation2 + $0x5c0] sm:$0xf]  ;;  %v4584_v52 = vld [vmem:[#allocation2 + $0x5cc] sm:$0xf0]  ;;  %v3581_v60 = vor.u32 %v4552_v49, %v3580_v48  ;;  %1297 = vmatmul.bf16.vlgmr.msra.gmra.mxu2 %v4874_v51  ;;  %1310 = vmatmul.bf16.vlgmr.msra.gmra.mxu3 %v4878_v57  ;;  %v3006_v44 = vld [vmem:[#allocation2 + $0x50] sm:$0xf0]  ;;  %v3153_v46 = vor.u32 %v4442_v35, %v3150_v36 }
  0x31   :  { %1354 = vmatpush.bf16.msrb.mxu3 %v3089_v47  ;;  %v3709_v63 = vor.u32 %v4584_v52, %v3708_v50  ;;  %v3564_v1 = vld [vmem:[#allocation2 + $0x4a0] sm:$0xf]  ;;  %v4548_v2 = vld [vmem:[#allocation2 + $0x4ac] sm:$0xf0]  ;;  %1271 = vmatmul.bf16.vlgmr.msra.gmra.mxu0 %v4876_v55  ;;  %v4438_v48 = vld [vmem:[#allocation2 + $0x144] sm:$0xf]  ;;  %v3009_v52 = vor.u32 %v4406_v43, %v3006_v44 }
  0x32   :  { %v3692_v3 = vld [vmem:[#allocation2 + $0x5a0] sm:$0xf]  ;;  %v4580_v4 = vld [vmem:[#allocation2 + $0x5ac] sm:$0xf0]  ;;  %1348 = vmatpush.bf16.msrb.mxu2 %v3741_v56  ;;  %1316 = vmatpush.bf16.msrb.mxu0 %v3581_v60  ;;  %v3565_v9 = vor.u32 %v4548_v2, %v3564_v1  ;;  %v3134_v49 = vld [vmem:[#allocation2 + $0x150] sm:$0xf0] }
  0x33   :  { %1329 = vmatpush.bf16.msrb.mxu1 %v3709_v63  ;;  %v3693_v12 = vor.u32 %v4580_v4, %v3692_v3  ;;  %v3548_v14 = vld [vmem:[#allocation2 + $0x480] sm:$0xf]  ;;  %v4544_v15 = vld [vmem:[#allocation2 + $0x48c] sm:$0xf0]  ;;  %v2990_v60 = vld [vmem:[#allocation2 + $0x30] sm:$0xf0]  ;;  %v3137_v61 = vor.u32 %v4438_v48, %v3134_v49 }
  0x34   :  { %v3676_v16 = vld [vmem:[#allocation2 + $0x580] sm:$0xf]  ;;  %v4576_v17 = vld [vmem:[#allocation2 + $0x58c] sm:$0xf0]  ;;  %v3549_v21 = vor.u32 %v4544_v15, %v3548_v14  ;;  %v4434_v63 = vld [vmem:[#allocation2 + $0x124] sm:$0xf] }
  0x35   :  { %1355 = vmatpush.bf16.msrb.mxu3 %v3073_v0  ;;  %v3677_v24 = vor.u32 %v4576_v17, %v3676_v16  ;;  %v3532_v26 = vld [vmem:[#allocation2 + $0x460] sm:$0xf]  ;;  %v4540_v27 = vld [vmem:[#allocation2 + $0x46c] sm:$0xf0]  ;;  %v3118_v0 = vld [vmem:[#allocation2 + $0x130] sm:$0xf0] }
  0x36   :  { %1367 = vmatpush.bf16.msra.mxu2 %v3217_v59  ;;  %1317 = vmatpush.bf16.msrb.mxu0 %v3565_v9  ;;  %v3660_v28 = vld [vmem:[#allocation2 + $0x560] sm:$0xf]  ;;  %v4572_v29 = vld [vmem:[#allocation2 + $0x56c] sm:$0xf0]  ;;  %v3533_v34 = vor.u32 %v4540_v27, %v3532_v26  ;;  %v4402_v59 = vld [vmem:[#allocation2 + $0x24] sm:$0xf]  ;;  %v3121_v14 = vor.u32 %v4434_v63, %v3118_v0 }
  0x37   :  { %1330 = vmatpush.bf16.msrb.mxu1 %v3693_v12  ;;  %v65_v32 = vld [vmem:[%s5127_s0 + $0x30] sm:$0xff]  ;;  %v3661_v37 = vor.u32 %v4572_v29, %v3660_v28  ;;  %v3516_v39 = vld [vmem:[#allocation2 + $0x440] sm:$0xf]  ;;  %v2993_v3 = vor.u32 %v4402_v59, %v2990_v60  ;;  %v4490_v10 = vld [vmem:[#allocation2 + $0x2e4] sm:$0xf] }
  0x38   :  { %v4536_v40 = vld [vmem:[#allocation2 + $0x44c] sm:$0xf0]  ;;  %v3644_v41 = vld [vmem:[#allocation2 + $0x540] sm:$0xf]  ;;  %v4892_v45 = vpack.c.bf16 %v65_v32, %v65_v32  ;;  %v2974_v9 = vld [vmem:[#allocation2 + $0x10] sm:$0xf0] }
  0x39   :  { %1356 = vmatpush.bf16.msrb.mxu3 %v3057_v13  ;;  %v4568_v42 = vld [vmem:[#allocation2 + $0x54c] sm:$0xf0]  ;;  %v3517_v47 = vor.u32 %v4536_v40, %v3516_v39  ;;  %v3500_v53 = vld [vmem:[#allocation2 + $0x420] sm:$0xf]  ;;  %v3342_v11 = vld [vmem:[#allocation2 + $0x2f0] sm:$0xf0] }
  0x3a   :  { %1368 = vmatpush.bf16.msra.mxu2 %v3201_v8  ;;  %1318 = vmatpush.bf16.msrb.mxu0 %v3549_v21  ;;  %v3645_v50 = vor.u32 %v4568_v42, %v3644_v41  ;;  %v4532_v54 = vld [vmem:[#allocation2 + $0x42c] sm:$0xf0]  ;;  %v3628_v56 = vld [vmem:[#allocation2 + $0x520] sm:$0xf]  ;;  %v4398_v8 = vld [vmem:[#allocation2 + $0x4] sm:$0xf] }
  0x3b   :  { %1331 = vmatpush.bf16.msrb.mxu1 %v3677_v24  ;;  %v4564_v58 = vld [vmem:[#allocation2 + $0x52c] sm:$0xf0]  ;;  %v3501_v62 = vor.u32 %v4532_v54, %v3500_v53  ;;  %v3484_v1 = vld [vmem:[#allocation2 + $0x400] sm:$0xf]  ;;  %v4522_v12 = vld [vmem:[#allocation2 + $0x3e4] sm:$0xf]  ;;  %v3345_v24 = vor.u32 %v4490_v10, %v3342_v11 }
  0x3c   :  { %v3629_v2 = vor.u32 %v4564_v58, %v3628_v56  ;;  %v4528_v4 = vld [vmem:[#allocation2 + $0x40c] sm:$0xf0]  ;;  %v3612_v5 = vld [vmem:[#allocation2 + $0x500] sm:$0xf]  ;;  %v3470_v13 = vld [vmem:[#allocation2 + $0x3f0] sm:$0xf0] }
  0x3d   :  { %1357 = vmatpush.bf16.msrb.mxu3 %v3041_v25  ;;  %v4560_v6 = vld [vmem:[#allocation2 + $0x50c] sm:$0xf0]  ;;  %v3485_v15 = vor.u32 %v4528_v4, %v3484_v1  ;;  %v4554_v16 = vld [vmem:[#allocation2 + $0x4e4] sm:$0xf]  ;;  %v3598_v17 = vld [vmem:[#allocation2 + $0x4f0] sm:$0xf0]  ;;  %v3473_v25 = vor.u32 %v4522_v12, %v3470_v13 }
  0x3e   :  { %1369 = vmatpush.bf16.msra.mxu2 %v3185_v20  ;;  %1319 = vmatpush.bf16.msrb.mxu0 %v3533_v34  ;;  %v63_v18 = vld [vmem:[%s5127_s0 + $0x20] sm:$0xff]  ;;  %v3613_v19 = vor.u32 %v4560_v6, %v3612_v5  ;;  %v2977_v20 = vor.u32 %v4398_v8, %v2974_v9  ;;  %v3102_v22 = vld [vmem:[#allocation2 + $0x110] sm:$0xf0]  ;;  %v64_v23 = vld [vmem:[%s5127_s0 + $0x28] sm:$0xff]  ;;  %v3601_v29 = vor.u32 %v4554_v16, %v3598_v17 }
  0x3f   :  { %1332 = vmatpush.bf16.msrb.mxu1 %v3661_v37  ;;  %v4430_v21 = vld [vmem:[#allocation2 + $0x104] sm:$0xf]  ;;  %v3726_v27 = vld [vmem:[#allocation2 + $0x5f0] sm:$0xf0]  ;;  %v4902_v30 = vpack.c.bf16 %v63_v18, %v63_v18  ;;  %v4904_v35 = vpack.c.bf16 %v64_v23, %v64_v23 }
  0x40   :  { %3754 = vmatmul.msk.bf16.vlgmr.msrb.gmra.mxu2 %vm1259_vm0, %v4892_v45  ;;  %v4586_v26 = vld [vmem:[#allocation2 + $0x5e4] sm:$0xf]  ;;  %v3326_v31 = vld [vmem:[#allocation2 + $0x2d0] sm:$0xf0]  ;;  %v3105_v34 = vor.u32 %v4430_v21, %v3102_v22 }
  0x41   :  { %1358 = vmatpush.bf16.msrb.mxu3 %v3025_v38  ;;  %v4486_v28 = vld [vmem:[#allocation2 + $0x2c4] sm:$0xf]  ;;  %v3582_v37 = vld [vmem:[#allocation2 + $0x4d0] sm:$0xf0]  ;;  %v3729_v38 = vor.u32 %v4586_v26, %v3726_v27 }
  0x42   :  { %1370 = vmatpush.bf16.msra.mxu2 %v3169_v33  ;;  %1320 = vmatpush.bf16.msrb.mxu0 %v3517_v47  ;;  %v4518_v32 = vld [vmem:[#allocation2 + $0x3c4] sm:$0xf]  ;;  %v3454_v33 = vld [vmem:[#allocation2 + $0x3d0] sm:$0xf0]  ;;  %v3329_v39 = vor.u32 %v4486_v28, %v3326_v31 }
  0x43   :  { %1333 = vmatpush.bf16.msrb.mxu1 %v3645_v50  ;;  %v4550_v36 = vld [vmem:[#allocation2 + $0x4c4] sm:$0xf]  ;;  %v3457_v40 = vor.u32 %v4518_v32, %v3454_v33  ;;  %v3710_v42 = vld [vmem:[#allocation2 + $0x5d0] sm:$0xf0] }
  0x44   :  { %v4582_v41 = vld [vmem:[#allocation2 + $0x5c4] sm:$0xf]  ;;  %v3585_v44 = vor.u32 %v4550_v36, %v3582_v37  ;;  %v3438_v48 = vld [vmem:[#allocation2 + $0x3b0] sm:$0xf0] }
  0x45   :  { %1359 = vmatpush.bf16.msrb.mxu3 %v3009_v52  ;;  %v4482_v43 = vld [vmem:[#allocation2 + $0x2a4] sm:$0xf]  ;;  %v3566_v50 = vld [vmem:[#allocation2 + $0x4b0] sm:$0xf0]  ;;  %v3713_v52 = vor.u32 %v4582_v41, %v3710_v42 }
  0x46   :  { %1371 = vmatpush.bf16.msra.mxu2 %v3153_v46  ;;  %1321 = vmatpush.bf16.msrb.mxu0 %v3501_v62  ;;  %v3310_v46 = vld [vmem:[#allocation2 + $0x2b0] sm:$0xf0]  ;;  %v4514_v47 = vld [vmem:[#allocation2 + $0x3a4] sm:$0xf] }
  0x47   :  { %1334 = vmatpush.bf16.msrb.mxu1 %v3629_v2  ;;  %v4546_v49 = vld [vmem:[#allocation2 + $0x4a4] sm:$0xf]  ;;  %v3313_v53 = vor.u32 %v4482_v43, %v3310_v46  ;;  %v3441_v54 = vor.u32 %v4514_v47, %v3438_v48  ;;  %v3694_v58 = vld [vmem:[#allocation2 + $0x5b0] sm:$0xf0] }
  0x48   :  { %v4578_v56 = vld [vmem:[#allocation2 + $0x5a4] sm:$0xf]  ;;  %v3569_v60 = vor.u32 %v4546_v49, %v3566_v50  ;;  %v3422_v63 = vld [vmem:[#allocation2 + $0x390] sm:$0xf0] }
  0x49   :  { %1360 = vmatpush.bf16.msrb.mxu3 %v2993_v3  ;;  %v4478_v59 = vld [vmem:[#allocation2 + $0x284] sm:$0xf]  ;;  %v3550_v1 = vld [vmem:[#allocation2 + $0x490] sm:$0xf0]  ;;  %v3697_v2 = vor.u32 %v4578_v56, %v3694_v58  ;;  %v3092_v56 = vld [vmem:[#allocation2 + $0xe8] sm:$0xf] }
  0x4a   :  { %1372 = vmatpush.bf16.msra.mxu2 %v3137_v61  ;;  %1322 = vmatpush.bf16.msrb.mxu0 %v3485_v15  ;;  %v3294_v61 = vld [vmem:[#allocation2 + $0x290] sm:$0xf0]  ;;  %v4510_v62 = vld [vmem:[#allocation2 + $0x384] sm:$0xf]  ;;  %v4429_v58 = vld [vmem:[#allocation2 + $0xf4] sm:$0xf0] }
  0x4b   :  { %1335 = vmatpush.bf16.msrb.mxu1 %v3613_v19  ;;  %v4542_v0 = vld [vmem:[#allocation2 + $0x484] sm:$0xf]  ;;  %v3297_v3 = vor.u32 %v4478_v59, %v3294_v61  ;;  %v3425_v4 = vor.u32 %v4510_v62, %v3422_v63  ;;  %v3678_v6 = vld [vmem:[#allocation2 + $0x590] sm:$0xf0]  ;;  %v3348_v62 = vld [vmem:[#allocation2 + $0x2e8] sm:$0xf] }
  0x4c   :  { %v4574_v5 = vld [vmem:[#allocation2 + $0x584] sm:$0xf]  ;;  %v3553_v9 = vor.u32 %v4542_v0, %v3550_v1  ;;  %v3278_v10 = vld [vmem:[#allocation2 + $0x270] sm:$0xf0]  ;;  %v4493_v63 = vld [vmem:[#allocation2 + $0x2f4] sm:$0xf0] }
  0x4d   :  { %1361 = vmatpush.bf16.msrb.mxu3 %v2977_v20  ;;  %1323 = vmatmul.bf16.vlgmr.msrb.gmra.mxu0 %v4902_v30  ;;  %v4474_v8 = vld [vmem:[#allocation2 + $0x264] sm:$0xf]  ;;  %v3406_v12 = vld [vmem:[#allocation2 + $0x370] sm:$0xf0]  ;;  %v3681_v15 = vor.u32 %v4574_v5, %v3678_v6  ;;  %v3093_v5 = vor.u32 %v4429_v58, %v3092_v56  ;;  %v3476_v6 = vld [vmem:[#allocation2 + $0x3e8] sm:$0xf] }
  0x4e   :  { %1373 = vmatpush.bf16.msra.mxu2 %v3121_v14  ;;  %1380 = vmatpush.bf16.msra.mxu0 %v3345_v24  ;;  %v4506_v11 = vld [vmem:[#allocation2 + $0x364] sm:$0xf]  ;;  %v3534_v14 = vld [vmem:[#allocation2 + $0x470] sm:$0xf0]  ;;  %v3281_v16 = vor.u32 %v4474_v8, %v3278_v10  ;;  %v4525_v8 = vld [vmem:[#allocation2 + $0x3f4] sm:$0xf0] }
  0x4f   :  { %1393 = vmatpush.bf16.msra.mxu1 %v3473_v25  ;;  %v4538_v13 = vld [vmem:[#allocation2 + $0x464] sm:$0xf]  ;;  %v3409_v17 = vor.u32 %v4506_v11, %v3406_v12  ;;  %v3662_v19 = vld [vmem:[#allocation2 + $0x570] sm:$0xf0]  ;;  %v3220_v10 = vld [vmem:[#allocation2 + $0x1e8] sm:$0xf]  ;;  %v3349_v12 = vor.u32 %v4493_v63, %v3348_v62 }
  0x50   :  { %1336 = vmatmul.bf16.vlgmr.msrb.gmra.mxu1 %v4904_v35  ;;  %1362 = vmatmul.bf16.vlgmr.msrb.gmra.mxu3 %v4876_v55  ;;  %v4570_v18 = vld [vmem:[#allocation2 + $0x564] sm:$0xf]  ;;  %v3537_v21 = vor.u32 %v4538_v13, %v3534_v14  ;;  %v3262_v22 = vld [vmem:[#allocation2 + $0x250] sm:$0xf0]  ;;  %v4461_v11 = vld [vmem:[#allocation2 + $0x1f4] sm:$0xf0] }
  0x51   :  { %1406 = vmatpush.bf16.msra.mxu3 %v3601_v29  ;;  %v4470_v20 = vld [vmem:[#allocation2 + $0x244] sm:$0xf]  ;;  %v3390_v24 = vld [vmem:[#allocation2 + $0x350] sm:$0xf0]  ;;  %v3665_v27 = vor.u32 %v4570_v18, %v3662_v19  ;;  %v3076_v14 = vld [vmem:[#allocation2 + $0xc8] sm:$0xf]  ;;  %v3221_v19 = vor.u32 %v4461_v11, %v3220_v10 }
  0x52   :  { %1374 = vmatpush.bf16.msra.mxu2 %v3105_v34  ;;  %1381 = vmatpush.bf16.msra.mxu0 %v3329_v39  ;;  %v4502_v23 = vld [vmem:[#allocation2 + $0x344] sm:$0xf]  ;;  %v3518_v26 = vld [vmem:[#allocation2 + $0x450] sm:$0xf0]  ;;  %v3265_v28 = vor.u32 %v4470_v20, %v3262_v22  ;;  %v4489_v18 = vld [vmem:[#allocation2 + $0x2d4] sm:$0xf0] }
  0x53   :  { %1394 = vmatpush.bf16.msra.mxu1 %v3457_v40  ;;  %v4534_v25 = vld [vmem:[#allocation2 + $0x444] sm:$0xf]  ;;  %v3393_v29 = vor.u32 %v4502_v23, %v3390_v24  ;;  %v3646_v32 = vld [vmem:[#allocation2 + $0x550] sm:$0xf0]  ;;  %v3460_v20 = vld [vmem:[#allocation2 + $0x3c8] sm:$0xf] }
  0x54   :  { %v4566_v31 = vld [vmem:[#allocation2 + $0x544] sm:$0xf]  ;;  %v3521_v34 = vor.u32 %v4534_v25, %v3518_v26  ;;  %v3246_v36 = vld [vmem:[#allocation2 + $0x230] sm:$0xf0]  ;;  %v3204_v23 = vld [vmem:[#allocation2 + $0x1c8] sm:$0xf] }
  0x55   :  { %1407 = vmatpush.bf16.msra.mxu3 %v3585_v44  ;;  %1375 = vmatmul.bf16.vlgmr.msra.gmra.mxu2 %v4885_v7  ;;  %v4466_v33 = vld [vmem:[#allocation2 + $0x224] sm:$0xf]  ;;  %v3502_v40 = vld [vmem:[#allocation2 + $0x430] sm:$0xf0]  ;;  %v3649_v41 = vor.u32 %v4566_v31, %v3646_v32  ;;  %v4457_v24 = vld [vmem:[#allocation2 + $0x1d4] sm:$0xf0] }
  0x56   :  { %1419 = vmatpush.bf16.msrb.mxu2 %v3729_v38  ;;  %1382 = vmatpush.bf16.msra.mxu0 %v3313_v53  ;;  %v4498_v37 = vld [vmem:[#allocation2 + $0x324] sm:$0xf]  ;;  %v3374_v38 = vld [vmem:[#allocation2 + $0x330] sm:$0xf0]  ;;  %v3249_v46 = vor.u32 %v4466_v33, %v3246_v36  ;;  %v3060_v26 = vld [vmem:[#allocation2 + $0xa8] sm:$0xf]  ;;  %v3205_v32 = vor.u32 %v4457_v24, %v3204_v23 }
  0x57   :  { %1395 = vmatpush.bf16.msra.mxu1 %v3441_v54  ;;  %v4530_v39 = vld [vmem:[#allocation2 + $0x424] sm:$0xf]  ;;  %v3630_v43 = vld [vmem:[#allocation2 + $0x530] sm:$0xf0]  ;;  %v3377_v47 = vor.u32 %v4498_v37, %v3374_v38  ;;  %v4485_v31 = vld [vmem:[#allocation2 + $0x2b4] sm:$0xf0] }
  0x58   :  { %v4562_v42 = vld [vmem:[#allocation2 + $0x524] sm:$0xf]  ;;  %v3230_v48 = vld [vmem:[#allocation2 + $0x210] sm:$0xf0]  ;;  %v3444_v33 = vld [vmem:[#allocation2 + $0x3a8] sm:$0xf] }
  0x59   :  { %1408 = vmatpush.bf16.msra.mxu3 %v3569_v60  ;;  %v4462_v44 = vld [vmem:[#allocation2 + $0x204] sm:$0xf]  ;;  %v3358_v50 = vld [vmem:[#allocation2 + $0x310] sm:$0xf0]  ;;  %v3633_v60 = vor.u32 %v4562_v42, %v3630_v43  ;;  %v3188_v37 = vld [vmem:[#allocation2 + $0x1a8] sm:$0xf] }
  0x5a   :  { %1420 = vmatpush.bf16.msrb.mxu2 %v3713_v52  ;;  %1383 = vmatpush.bf16.msra.mxu0 %v3297_v3  ;;  %v4494_v49 = vld [vmem:[#allocation2 + $0x304] sm:$0xf]  ;;  %v3505_v52 = vor.u32 %v4530_v39, %v3502_v40  ;;  %v3486_v54 = vld [vmem:[#allocation2 + $0x410] sm:$0xf0]  ;;  %v3233_v0 = vor.u32 %v4462_v44, %v3230_v48  ;;  %v4453_v38 = vld [vmem:[#allocation2 + $0x1b4] sm:$0xf0] }
  0x5b   :  { %1396 = vmatpush.bf16.msra.mxu1 %v3425_v4  ;;  %v4526_v53 = vld [vmem:[#allocation2 + $0x404] sm:$0xf]  ;;  %v3742_v61 = vld [vmem:[#allocation2 + $0x610] sm:$0xf0]  ;;  %v3361_v1 = vor.u32 %v4494_v49, %v3358_v50  ;;  %v3044_v40 = vld [vmem:[#allocation2 + $0x88] sm:$0xf] }
  0x5c   :  { %v4590_v59 = vld [vmem:[#allocation2 + $0x604] sm:$0xf]  ;;  %v3614_v3 = vld [vmem:[#allocation2 + $0x510] sm:$0xf0]  ;;  %v3489_v4 = vor.u32 %v4526_v53, %v3486_v54  ;;  %v3300_v43 = vld [vmem:[#allocation2 + $0x288] sm:$0xf] }
  0x5d   :  { %1409 = vmatpush.bf16.msra.mxu3 %v3553_v9  ;;  %v3745_v9 = vor.u32 %v4590_v59, %v3742_v61  ;;  %v4481_v44 = vld [vmem:[#allocation2 + $0x294] sm:$0xf0]  ;;  %v3172_v50 = vld [vmem:[#allocation2 + $0x188] sm:$0xf] }
  0x5e   :  { %1421 = vmatpush.bf16.msrb.mxu2 %v3697_v2  ;;  %1384 = vmatpush.bf16.msra.mxu0 %v3281_v16  ;;  %v4558_v2 = vld [vmem:[#allocation2 + $0x504] sm:$0xf]  ;;  %v3477_v16 = vor.u32 %v4525_v8, %v3476_v6  ;;  %v4513_v48 = vld [vmem:[#allocation2 + $0x394] sm:$0xf0]  ;;  %v3301_v53 = vor.u32 %v4481_v44, %v3300_v43  ;;  %v3028_v54 = vld [vmem:[#allocation2 + $0x68] sm:$0xf] }
  0x5f   :  { %1397 = vmatpush.bf16.msra.mxu1 %v3409_v17  ;;  %v3617_v13 = vor.u32 %v4558_v2, %v3614_v3  ;;  %v3332_v17 = vld [vmem:[#allocation2 + $0x2c8] sm:$0xf]  ;;  %v4413_v56 = vld [vmem:[#allocation2 + $0x74] sm:$0xf0] }
  0x60   :  { %v3333_v25 = vor.u32 %v4489_v18, %v3332_v17  ;;  %v3284_v59 = vld [vmem:[#allocation2 + $0x268] sm:$0xf]  ;;  %v4509_v63 = vld [vmem:[#allocation2 + $0x374] sm:$0xf0] }
  0x61   :  { %1410 = vmatpush.bf16.msra.mxu3 %v3537_v21  ;;  %v4521_v21 = vld [vmem:[#allocation2 + $0x3d4] sm:$0xf0]  ;;  %v3412_v62 = vld [vmem:[#allocation2 + $0x368] sm:$0xf] }
  0x62   :  { %1422 = vmatpush.bf16.msrb.mxu2 %v3681_v15  ;;  %1385 = vmatpush.bf16.msra.mxu0 %v3265_v28  ;;  %v4425_v15 = vld [vmem:[#allocation2 + $0xd4] sm:$0xf0]  ;;  %v3461_v28 = vor.u32 %v4521_v21, %v3460_v20  ;;  %v3413_v6 = vor.u32 %v4509_v63, %v3412_v62  ;;  %v3268_v8 = vld [vmem:[#allocation2 + $0x248] sm:$0xf] }
  0x63   :  { %1398 = vmatpush.bf16.msra.mxu1 %v3393_v29  ;;  %v3077_v22 = vor.u32 %v4425_v15, %v3076_v14  ;;  %v3316_v29 = vld [vmem:[#allocation2 + $0x2a8] sm:$0xf]  ;;  %v4445_v2 = vld [vmem:[#allocation2 + $0x174] sm:$0xf0] }
  0x64   :  { %v3317_v39 = vor.u32 %v4485_v31, %v3316_v29  ;;  %v3396_v11 = vld [vmem:[#allocation2 + $0x348] sm:$0xf]  ;;  %v4441_v15 = vld [vmem:[#allocation2 + $0x154] sm:$0xf0] }
  0x65   :  { %1411 = vmatpush.bf16.msra.mxu3 %v3521_v34  ;;  %v4517_v34 = vld [vmem:[#allocation2 + $0x3b4] sm:$0xf0]  ;;  %v3140_v14 = vld [vmem:[#allocation2 + $0x148] sm:$0xf] }
  0x66   :  { %1423 = vmatpush.bf16.msrb.mxu2 %v3665_v27  ;;  %1386 = vmatpush.bf16.msra.mxu0 %v3249_v46  ;;  %v4421_v27 = vld [vmem:[#allocation2 + $0xb4] sm:$0xf0]  ;;  %v3445_v42 = vor.u32 %v4517_v34, %v3444_v33  ;;  %v3189_v46 = vor.u32 %v4453_v38, %v3188_v37  ;;  %v2996_v17 = vld [vmem:[#allocation2 + $0x28] sm:$0xf] }
  0x67   :  { %1399 = vmatpush.bf16.msra.mxu1 %v3377_v47  ;;  %v3061_v36 = vor.u32 %v4421_v27, %v3060_v26  ;;  %v3428_v47 = vld [vmem:[#allocation2 + $0x388] sm:$0xf]  ;;  %v4405_v18 = vld [vmem:[#allocation2 + $0x34] sm:$0xf0] }
  0x68   :  { %v3429_v58 = vor.u32 %v4513_v48, %v3428_v47  ;;  %v3252_v20 = vld [vmem:[#allocation2 + $0x228] sm:$0xf]  ;;  %v4469_v21 = vld [vmem:[#allocation2 + $0x234] sm:$0xf0]  ;;  %v4427_v47 = vld [vmem:[#allocation2 + $0xec] sm:$0xf] }
  0x69   :  { %1412 = vmatpush.bf16.msra.mxu3 %v3505_v52  ;;  %v4449_v52 = vld [vmem:[#allocation2 + $0x194] sm:$0xf0]  ;;  %v3380_v23 = vld [vmem:[#allocation2 + $0x328] sm:$0xf]  ;;  %v3253_v29 = vor.u32 %v4469_v21, %v3252_v20  ;;  %v3094_v48 = vld [vmem:[#allocation2 + $0xf8] sm:$0xf0] }
  0x6a   :  { %1424 = vmatpush.bf16.msrb.mxu2 %v3649_v41  ;;  %1387 = vmatpush.bf16.msra.mxu0 %v3233_v0  ;;  %v4417_v41 = vld [vmem:[#allocation2 + $0x94] sm:$0xf0]  ;;  %v3173_v61 = vor.u32 %v4449_v52, %v3172_v50  ;;  %v3029_v0 = vor.u32 %v4413_v56, %v3028_v54  ;;  %v3124_v26 = vld [vmem:[#allocation2 + $0x128] sm:$0xf]  ;;  %v3097_v63 = vor.u32 %v4427_v47, %v3094_v48 }
  0x6b   :  { %1400 = vmatpush.bf16.msra.mxu1 %v3361_v1  ;;  %v3045_v49 = vor.u32 %v4417_v41, %v3044_v40  ;;  %v3156_v1 = vld [vmem:[#allocation2 + $0x168] sm:$0xf]  ;;  %v4501_v24 = vld [vmem:[#allocation2 + $0x334] sm:$0xf0] }
  0x6c   :  { %v3157_v10 = vor.u32 %v4445_v2, %v3156_v1  ;;  %v4437_v27 = vld [vmem:[#allocation2 + $0x134] sm:$0xf0]  ;;  %v3381_v34 = vor.u32 %v4501_v24, %v3380_v23  ;;  %v3236_v37 = vld [vmem:[#allocation2 + $0x208] sm:$0xf]  ;;  %v4423_v1 = vld [vmem:[#allocation2 + $0xcc] sm:$0xf] }
  0x6d   :  { %1413 = vmatpush.bf16.msra.mxu3 %v3489_v4  ;;  %1388 = vmatmul.bf16.vlgmr.msra.gmra.mxu0 %v4874_v51  ;;  %v3012_v4 = vld [vmem:[#allocation2 + $0x48] sm:$0xf]  ;;  %v4401_v31 = vld [vmem:[#allocation2 + $0x14] sm:$0xf0]  ;;  %v3125_v40 = vor.u32 %v4437_v27, %v3124_v26  ;;  %v3078_v2 = vld [vmem:[#allocation2 + $0xd8] sm:$0xf0] }
  0x6e   :  { %1425 = vmatpush.bf16.msrb.mxu2 %v3633_v60  ;;  %1471 = vmatpush.bf16.msrb.mxu0 %v3349_v12  ;;  %v4477_v60 = vld [vmem:[#allocation2 + $0x274] sm:$0xf0]  ;;  %v3732_v52 = vld [vmem:[#allocation2 + $0x5e8] sm:$0xf]  ;;  %v3190_v23 = vld [vmem:[#allocation2 + $0x1b8] sm:$0xf0] }
  0x6f   :  { %1445 = vmatpush.bf16.msrb.mxu1 %v3093_v5  ;;  %v3285_v3 = vor.u32 %v4477_v60, %v3284_v59  ;;  %v4409_v5 = vld [vmem:[#allocation2 + $0x54] sm:$0xf0]  ;;  %v3588_v54 = vld [vmem:[#allocation2 + $0x4c8] sm:$0xf]  ;;  %v4459_v60 = vld [vmem:[#allocation2 + $0x1ec] sm:$0xf] }
  0x70   :  { %1414 = vmatmul.bf16.vlgmr.msra.gmra.mxu3 %v4902_v30  ;;  %1401 = vmatmul.bf16.vlgmr.msra.gmra.mxu1 %v4878_v57  ;;  %v4505_v12 = vld [vmem:[#allocation2 + $0x354] sm:$0xf0]  ;;  %v3556_v20 = vld [vmem:[#allocation2 + $0x488] sm:$0xf]  ;;  %v4415_v26 = vld [vmem:[#allocation2 + $0x8c] sm:$0xf] }
  0x71   :  { %1439 = vmatpush.bf16.msrb.mxu3 %v3745_v9  ;;  %v4473_v9 = vld [vmem:[#allocation2 + $0x254] sm:$0xf0]  ;;  %v3046_v27 = vld [vmem:[#allocation2 + $0x98] sm:$0xf0]  ;;  %v3524_v47 = vld [vmem:[#allocation2 + $0x448] sm:$0xf] }
  0x72   :  { %1426 = vmatpush.bf16.msrb.mxu2 %v3617_v13  ;;  %1472 = vmatpush.bf16.msrb.mxu0 %v3333_v25  ;;  %v3013_v13 = vor.u32 %v4409_v5, %v3012_v4  ;;  %v2997_v25 = vor.u32 %v4405_v18, %v2996_v17  ;;  %v4557_v33 = vld [vmem:[#allocation2 + $0x4f4] sm:$0xf0]  ;;  %v3716_v5 = vld [vmem:[#allocation2 + $0x5c8] sm:$0xf] }
  0x73   :  { %1446 = vmatpush.bf16.msrb.mxu1 %v3077_v22  ;;  %v3141_v22 = vor.u32 %v4441_v15, %v3140_v14  ;;  %v4465_v38 = vld [vmem:[#allocation2 + $0x214] sm:$0xf0]  ;;  %v4419_v14 = vld [vmem:[#allocation2 + $0xac] sm:$0xf]  ;;  %v3062_v15 = vld [vmem:[#allocation2 + $0xb8] sm:$0xf0] }
  0x74   :  { %v4497_v41 = vld [vmem:[#allocation2 + $0x314] sm:$0xf0]  ;;  %v3237_v50 = vor.u32 %v4465_v38, %v3236_v37  ;;  %v3700_v18 = vld [vmem:[#allocation2 + $0x5a8] sm:$0xf]  ;;  %v3065_v24 = vor.u32 %v4419_v14, %v3062_v15  ;;  %v3174_v37 = vld [vmem:[#allocation2 + $0x198] sm:$0xf0]  ;;  %v3049_v38 = vor.u32 %v4415_v26, %v3046_v27 }
  0x75   :  { %1458 = vmatpush.bf16.msra.mxu3 %v3221_v19  ;;  %1427 = vmatmul.bf16.vlgmr.msrb.gmra.mxu2 %v4904_v35  ;;  %v3397_v19 = vor.u32 %v4505_v12, %v3396_v11  ;;  %v4593_v43 = vld [vmem:[#allocation2 + $0x614] sm:$0xf0]  ;;  %v3206_v11 = vld [vmem:[#allocation2 + $0x1d8] sm:$0xf0]  ;;  %v3081_v12 = vor.u32 %v4423_v1, %v3078_v2 }
  0x76   :  { %1484 = vmatpush.bf16.msra.mxu2 %v3477_v16  ;;  %1473 = vmatpush.bf16.msrb.mxu0 %v3317_v39  ;;  %v3269_v16 = vor.u32 %v4473_v9, %v3268_v8  ;;  %v3364_v39 = vld [vmem:[#allocation2 + $0x308] sm:$0xf]  ;;  %v4549_v9 = vld [vmem:[#allocation2 + $0x4b4] sm:$0xf0]  ;;  %v3142_v1 = vld [vmem:[#allocation2 + $0x158] sm:$0xf0] }
  0x77   :  { %1447 = vmatpush.bf16.msrb.mxu1 %v3061_v36  ;;  %v3108_v36 = vld [vmem:[#allocation2 + $0x108] sm:$0xf]  ;;  %v3365_v56 = vor.u32 %v4497_v41, %v3364_v39  ;;  %v4545_v21 = vld [vmem:[#allocation2 + $0x494] sm:$0xf0]  ;;  %v3030_v41 = vld [vmem:[#allocation2 + $0x78] sm:$0xf0] }
  0x78   :  { %v3572_v8 = vld [vmem:[#allocation2 + $0x4a8] sm:$0xf]  ;;  %v4537_v48 = vld [vmem:[#allocation2 + $0x454] sm:$0xf0]  ;;  %v3126_v14 = vld [vmem:[#allocation2 + $0x138] sm:$0xf0] }
  0x79   :  { %1459 = vmatpush.bf16.msra.mxu3 %v3205_v32  ;;  %v3604_v32 = vld [vmem:[#allocation2 + $0x4e8] sm:$0xf]  ;;  %v3478_v26 = vld [vmem:[#allocation2 + $0x3f8] sm:$0xf0] }
  0x7a   :  { %1485 = vmatpush.bf16.msra.mxu2 %v3461_v28  ;;  %1474 = vmatpush.bf16.msrb.mxu0 %v3301_v53  ;;  %v2980_v28 = vld [vmem:[#allocation2 + $0x8] sm:$0xf]  ;;  %v4589_v53 = vld [vmem:[#allocation2 + $0x5f4] sm:$0xf0] }
  0x7b   :  { %1448 = vmatpush.bf16.msrb.mxu1 %v3045_v49  ;;  %v2981_v44 = vor.u32 %v4401_v31, %v2980_v28  ;;  %v3605_v49 = vor.u32 %v4557_v33, %v3604_v32  ;;  %v3557_v28 = vor.u32 %v4545_v21, %v3556_v20  ;;  %v3684_v31 = vld [vmem:[#allocation2 + $0x588] sm:$0xf]  ;;  %v4577_v32 = vld [vmem:[#allocation2 + $0x594] sm:$0xf0]  ;;  %v4399_v20 = vld [vmem:[#allocation2 + $0xc] sm:$0xf] }
  0x7c   :  { %v3540_v33 = vld [vmem:[#allocation2 + $0x468] sm:$0xf]  ;;  %v3685_v39 = vor.u32 %v4577_v32, %v3684_v31  ;;  %v2982_v21 = vld [vmem:[#allocation2 + $0x18] sm:$0xf0]  ;;  %v4487_v31 = vld [vmem:[#allocation2 + $0x2cc] sm:$0xf] }
  0x7d   :  { %1460 = vmatpush.bf16.msra.mxu3 %v3189_v46  ;;  %v4433_v46 = vld [vmem:[#allocation2 + $0x114] sm:$0xf0]  ;;  %v2985_v32 = vor.u32 %v4399_v20, %v2982_v21  ;;  %v4507_v20 = vld [vmem:[#allocation2 + $0x36c] sm:$0xf] }
  0x7e   :  { %1486 = vmatpush.bf16.msra.mxu2 %v3445_v42  ;;  %1475 = vmatpush.bf16.msrb.mxu0 %v3285_v3  ;;  %v3748_v42 = vld [vmem:[#allocation2 + $0x608] sm:$0xf]  ;;  %v3109_v62 = vor.u32 %v4433_v46, %v3108_v36  ;;  %v4447_v36 = vld [vmem:[#allocation2 + $0x18c] sm:$0xf]  ;;  %v4573_v46 = vld [vmem:[#allocation2 + $0x574] sm:$0xf0] }
  0x7f   :  { %1449 = vmatpush.bf16.msrb.mxu1 %v3029_v0  ;;  %v3749_v59 = vor.u32 %v4593_v43, %v3748_v42  ;;  %v3733_v0 = vor.u32 %v4589_v53, %v3732_v52  ;;  %v3177_v43 = vor.u32 %v4447_v36, %v3174_v37  ;;  %v3110_v36 = vld [vmem:[#allocation2 + $0x118] sm:$0xf0] }
  0x80   :  { %3755 = vmatmul.msk.bf16.vlgmr.msrb.gmra.mxu3 %vm1259_vm0, %v4892_v45 }
  0x81   :  { %1461 = vmatpush.bf16.msra.mxu3 %v3173_v61  ;;  %v3222_v61 = vld [vmem:[#allocation2 + $0x1f8] sm:$0xf0] }
  0x82   :  { %1487 = vmatpush.bf16.msra.mxu2 %v3429_v58  ;;  %1476 = vmatpush.bf16.msrb.mxu0 %v3269_v16  ;;  %v4553_v58 = vld [vmem:[#allocation2 + $0x4d4] sm:$0xf0]  ;;  %v3225_v4 = vor.u32 %v4459_v60, %v3222_v61  ;;  %v3573_v16 = vor.u32 %v4549_v9, %v3572_v8  ;;  %v3652_v60 = vld [vmem:[#allocation2 + $0x548] sm:$0xf] }
  0x83   :  { %1450 = vmatpush.bf16.msrb.mxu1 %v3013_v13  ;;  %v3589_v3 = vor.u32 %v4553_v58, %v3588_v54  ;;  %v4407_v54 = vld [vmem:[#allocation2 + $0x4c] sm:$0xf]  ;;  %v3525_v58 = vor.u32 %v4537_v48, %v3524_v47  ;;  %v4569_v61 = vld [vmem:[#allocation2 + $0x554] sm:$0xf0]  ;;  %v3636_v9 = vld [vmem:[#allocation2 + $0x528] sm:$0xf] }
  0x84   :  { %v4551_v47 = vld [vmem:[#allocation2 + $0x4cc] sm:$0xf]  ;;  %v3590_v48 = vld [vmem:[#allocation2 + $0x4d8] sm:$0xf0] }
  0x85   :  { %1462 = vmatpush.bf16.msra.mxu3 %v3157_v10  ;;  %v4455_v10 = vld [vmem:[#allocation2 + $0x1cc] sm:$0xf] }
  0x86   :  { %1488 = vmatpush.bf16.msra.mxu2 %v3413_v6  ;;  %1477 = vmatpush.bf16.msrb.mxu0 %v3253_v29  ;;  %v4585_v6 = vld [vmem:[#allocation2 + $0x5d4] sm:$0xf0]  ;;  %v3209_v17 = vor.u32 %v4455_v10, %v3206_v11  ;;  %v3492_v11 = vld [vmem:[#allocation2 + $0x408] sm:$0xf] }
  0x87   :  { %1451 = vmatpush.bf16.msrb.mxu1 %v2997_v25  ;;  %v3717_v13 = vor.u32 %v4585_v6, %v3716_v5  ;;  %v2998_v5 = vld [vmem:[#allocation2 + $0x38] sm:$0xf0]  ;;  %v4565_v10 = vld [vmem:[#allocation2 + $0x534] sm:$0xf0] }
  0x89   :  { %1463 = vmatpush.bf16.msra.mxu3 %v3141_v22  ;;  %v4451_v22 = vld [vmem:[#allocation2 + $0x1ac] sm:$0xf] }
  0x8a   :  { %1489 = vmatpush.bf16.msra.mxu2 %v3397_v19  ;;  %1478 = vmatpush.bf16.msrb.mxu0 %v3237_v50  ;;  %v4581_v19 = vld [vmem:[#allocation2 + $0x5b4] sm:$0xf0]  ;;  %v3193_v29 = vor.u32 %v4451_v22, %v3190_v23  ;;  %v3158_v50 = vld [vmem:[#allocation2 + $0x178] sm:$0xf0] }
  0x8b   :  { %1452 = vmatpush.bf16.msrb.mxu1 %v2981_v44  ;;  %v3701_v25 = vor.u32 %v4581_v19, %v3700_v18  ;;  %v3668_v44 = vld [vmem:[#allocation2 + $0x568] sm:$0xf]  ;;  %v3637_v18 = vor.u32 %v4565_v10, %v3636_v9  ;;  %v3430_v10 = vld [vmem:[#allocation2 + $0x398] sm:$0xf0] }
  0x8c   :  { %v3669_v53 = vor.u32 %v4573_v46, %v3668_v44  ;;  %v3620_v19 = vld [vmem:[#allocation2 + $0x508] sm:$0xf]  ;;  %v3462_v46 = vld [vmem:[#allocation2 + $0x3d8] sm:$0xf0] }
  0x8d   :  { %1464 = vmatpush.bf16.msra.mxu3 %v3125_v40  ;;  %1479 = vmatmul.bf16.vlgmr.msrb.gmra.mxu0 %v4874_v51  ;;  %v4411_v40 = vld [vmem:[#allocation2 + $0x6c] sm:$0xf] }
  0x8e   :  { %1490 = vmatpush.bf16.msra.mxu2 %v3381_v34  ;;  %1530 = vmatpush.bf16.msra.mxu0 %v3749_v59  ;;  %v4541_v34 = vld [vmem:[#allocation2 + $0x474] sm:$0xf0]  ;;  %v3033_v52 = vor.u32 %v4411_v40, %v3030_v41 }
  0x8f   :  { %1497 = vmatpush.bf16.msra.mxu1 %v3605_v49  ;;  %v3541_v42 = vor.u32 %v4541_v34, %v3540_v33  ;;  %v4443_v49 = vld [vmem:[#allocation2 + $0x16c] sm:$0xf]  ;;  %v3334_v33 = vld [vmem:[#allocation2 + $0x2d8] sm:$0xf0] }
  0x90   :  { %1453 = vmatmul.bf16.vlgmr.msrb.gmra.mxu1 %v4876_v55  ;;  %v3161_v59 = vor.u32 %v4443_v49, %v3158_v50  ;;  %v4431_v34 = vld [vmem:[#allocation2 + $0x10c] sm:$0xf] }
  0x91   :  { %1465 = vmatpush.bf16.msra.mxu3 %v3109_v62  ;;  %v3508_v62 = vld [vmem:[#allocation2 + $0x428] sm:$0xf]  ;;  %v3113_v44 = vor.u32 %v4431_v34, %v3110_v36  ;;  %v4483_v50 = vld [vmem:[#allocation2 + $0x2ac] sm:$0xf] }
  0x92   :  { %1491 = vmatpush.bf16.msra.mxu2 %v3365_v56  ;;  %1549 = vmatpush.bf16.msrb.mxu0 %v3225_v4  ;;  %v3014_v56 = vld [vmem:[#allocation2 + $0x58] sm:$0xf0]  ;;  %v4403_v4 = vld [vmem:[#allocation2 + $0x2c] sm:$0xf] }
  0x93   :  { %1498 = vmatpush.bf16.msra.mxu1 %v3589_v3  ;;  %v3017_v2 = vor.u32 %v4407_v54, %v3014_v56  ;;  %v3653_v3 = vor.u32 %v4569_v61, %v3652_v60  ;;  %v3001_v15 = vor.u32 %v4403_v4, %v2998_v5  ;;  %v3718_v54 = vld [vmem:[#allocation2 + $0x5d8] sm:$0xf0]  ;;  %v4503_v34 = vld [vmem:[#allocation2 + $0x34c] sm:$0xf] }
  0x94   :  { %1466 = vmatmul.bf16.vlgmr.msra.gmra.mxu3 %v4885_v7  ;;  %v3446_v61 = vld [vmem:[#allocation2 + $0x3b8] sm:$0xf0] }
  0x95   :  { %1510 = vmatpush.bf16.msrb.mxu3 %v3733_v0  ;;  %1492 = vmatmul.bf16.vlgmr.msra.gmra.mxu2 %v4878_v57  ;;  %v4439_v0 = vld [vmem:[#allocation2 + $0x14c] sm:$0xf]  ;;  %v3702_v4 = vld [vmem:[#allocation2 + $0x5b8] sm:$0xf0] }
  0x96   :  { %1536 = vmatpush.bf16.msrb.mxu2 %v3097_v63  ;;  %1550 = vmatpush.bf16.msrb.mxu0 %v3209_v17  ;;  %v4533_v63 = vld [vmem:[#allocation2 + $0x434] sm:$0xf0]  ;;  %v3145_v8 = vor.u32 %v4439_v0, %v3142_v1  ;;  %v3350_v17 = vld [vmem:[#allocation2 + $0x2f8] sm:$0xf0]  ;;  %v4479_v1 = vld [vmem:[#allocation2 + $0x28c] sm:$0xf] }
  0x97   :  { %1499 = vmatpush.bf16.msra.mxu1 %v3573_v16  ;;  %v3509_v6 = vor.u32 %v4533_v63, %v3508_v62  ;;  %v4491_v16 = vld [vmem:[#allocation2 + $0x2ec] sm:$0xf]  ;;  %v3574_v63 = vld [vmem:[#allocation2 + $0x4b8] sm:$0xf0] }
  0x98   :  { %v3353_v27 = vor.u32 %v4491_v16, %v3350_v17  ;;  %v4547_v62 = vld [vmem:[#allocation2 + $0x4ac] sm:$0xf]  ;;  %v3686_v17 = vld [vmem:[#allocation2 + $0x598] sm:$0xf0] }
  0x99   :  { %1511 = vmatpush.bf16.msrb.mxu3 %v3717_v13  ;;  %v4435_v13 = vld [vmem:[#allocation2 + $0x12c] sm:$0xf] }
  0x9a   :  { %1537 = vmatpush.bf16.msrb.mxu2 %v3081_v12  ;;  %1551 = vmatpush.bf16.msrb.mxu0 %v3193_v29  ;;  %v4529_v12 = vld [vmem:[#allocation2 + $0x414] sm:$0xf0]  ;;  %v3129_v23 = vor.u32 %v4435_v13, %v3126_v14  ;;  %v3606_v29 = vld [vmem:[#allocation2 + $0x4f8] sm:$0xf0]  ;;  %v4475_v14 = vld [vmem:[#allocation2 + $0x26c] sm:$0xf] }
  0x9b   :  { %1500 = vmatpush.bf16.msra.mxu1 %v3557_v28  ;;  %v3493_v22 = vor.u32 %v4529_v12, %v3492_v11  ;;  %v4555_v28 = vld [vmem:[#allocation2 + $0x4ec] sm:$0xf]  ;;  %v3558_v12 = vld [vmem:[#allocation2 + $0x498] sm:$0xf0] }
  0x9c   :  { %v3609_v41 = vor.u32 %v4555_v28, %v3606_v29  ;;  %v4543_v11 = vld [vmem:[#allocation2 + $0x48c] sm:$0xf]  ;;  %v3670_v29 = vld [vmem:[#allocation2 + $0x578] sm:$0xf0] }
  0x9d   :  { %1512 = vmatpush.bf16.msrb.mxu3 %v3701_v25  ;;  %3756 = vmatmul.msk.bf16.vlgmr.msra.gmra.mxu0 %vm1259_vm0, %v4892_v45  ;;  %v4523_v25 = vld [vmem:[#allocation2 + $0x3ec] sm:$0xf] }
  0x9e   :  { %1538 = vmatpush.bf16.msrb.mxu2 %v3065_v24  ;;  %1552 = vmatpush.bf16.msrb.mxu0 %v3177_v43  ;;  %v4561_v24 = vld [vmem:[#allocation2 + $0x514] sm:$0xf0]  ;;  %v3481_v40 = vor.u32 %v4523_v25, %v3478_v26  ;;  %v3337_v43 = vor.u32 %v4487_v31, %v3334_v33  ;;  %v4471_v26 = vld [vmem:[#allocation2 + $0x24c] sm:$0xf] }
  0x9f   :  { %1501 = vmatpush.bf16.msra.mxu1 %v3541_v42  ;;  %v3621_v37 = vor.u32 %v4561_v24, %v3620_v19  ;;  %v4519_v42 = vld [vmem:[#allocation2 + $0x3cc] sm:$0xf]  ;;  %v3561_v19 = vor.u32 %v4543_v11, %v3558_v12  ;;  %v3542_v24 = vld [vmem:[#allocation2 + $0x478] sm:$0xf0] }
  0xa0   :  { %v3465_v56 = vor.u32 %v4519_v42, %v3462_v46  ;;  %v4571_v28 = vld [vmem:[#allocation2 + $0x56c] sm:$0xf]  ;;  %v3494_v11 = vld [vmem:[#allocation2 + $0x418] sm:$0xf0] }
  0xa1   :  { %1513 = vmatpush.bf16.msrb.mxu3 %v3685_v39  ;;  %v3734_v39 = vld [vmem:[#allocation2 + $0x5f8] sm:$0xf0]  ;;  %v4467_v42 = vld [vmem:[#allocation2 + $0x22c] sm:$0xf] }
  0xa2   :  { %1539 = vmatpush.bf16.msrb.mxu2 %v3049_v38  ;;  %1553 = vmatpush.bf16.msrb.mxu0 %v3161_v59  ;;  %v4587_v38 = vld [vmem:[#allocation2 + $0x5ec] sm:$0xf] }
  0xa3   :  { %1502 = vmatpush.bf16.msra.mxu1 %v3525_v58  ;;  %v3737_v49 = vor.u32 %v4587_v38, %v3734_v39  ;;  %v3593_v58 = vor.u32 %v4551_v47, %v3590_v48  ;;  %v4515_v59 = vld [vmem:[#allocation2 + $0x3ac] sm:$0xf]  ;;  %v3398_v38 = vld [vmem:[#allocation2 + $0x358] sm:$0xf0] }
  0xa4   :  { %v3449_v5 = vor.u32 %v4515_v59, %v3446_v61  ;;  %v4535_v39 = vld [vmem:[#allocation2 + $0x44c] sm:$0xf]  ;;  %v3654_v47 = vld [vmem:[#allocation2 + $0x558] sm:$0xf0]  ;;  %v3401_v48 = vor.u32 %v4503_v34, %v3398_v38  ;;  %v3840_v38 = vld [vmem:[#allocation4 + $0xa0] sm:$0xf] }
  0xa5   :  { %1514 = vmatpush.bf16.msrb.mxu3 %v3669_v53  ;;  %v4583_v53 = vld [vmem:[#allocation2 + $0x5cc] sm:$0xf] }
  0xa6   :  { %1540 = vmatpush.bf16.msrb.mxu2 %v3033_v52  ;;  %1554 = vmatpush.bf16.msrb.mxu0 %v3145_v8  ;;  %v3318_v52 = vld [vmem:[#allocation2 + $0x2b8] sm:$0xf0]  ;;  %v3721_v0 = vor.u32 %v4583_v53, %v3718_v54  ;;  %v4511_v8 = vld [vmem:[#allocation2 + $0x38c] sm:$0xf] }
  0xa7   :  { %1503 = vmatpush.bf16.msra.mxu1 %v3509_v6  ;;  %v3321_v60 = vor.u32 %v4483_v50, %v3318_v52  ;;  %v3577_v6 = vor.u32 %v4547_v62, %v3574_v63  ;;  %v4567_v46 = vld [vmem:[#allocation2 + $0x54c] sm:$0xf]  ;;  %v3382_v53 = vld [vmem:[#allocation2 + $0x338] sm:$0xf0] }
  0xa8   :  { %v4499_v50 = vld [vmem:[#allocation2 + $0x32c] sm:$0xf]  ;;  %v3638_v63 = vld [vmem:[#allocation2 + $0x538] sm:$0xf0] }
  0xa9   :  { %1515 = vmatpush.bf16.msrb.mxu3 %v3653_v3  ;;  %v4579_v3 = vld [vmem:[#allocation2 + $0x5ac] sm:$0xf] }
  0xaa   :  { %1541 = vmatpush.bf16.msrb.mxu2 %v3017_v2  ;;  %1555 = vmatpush.bf16.msrb.mxu0 %v3129_v23  ;;  %v3302_v2 = vld [vmem:[#allocation2 + $0x298] sm:$0xf0]  ;;  %v3705_v13 = vor.u32 %v4579_v3, %v3702_v4  ;;  %v4539_v23 = vld [vmem:[#allocation2 + $0x46c] sm:$0xf]  ;;  %v3385_v4 = vor.u32 %v4499_v50, %v3382_v53 }
  0xab   :  { %1504 = vmatpush.bf16.msra.mxu1 %v3493_v22  ;;  %v3305_v9 = vor.u32 %v4479_v1, %v3302_v2  ;;  %v3414_v22 = vld [vmem:[#allocation2 + $0x378] sm:$0xf0]  ;;  %v4928_v25 = vpop.f32.mrf.mxu1  ;;  %v3545_v33 = vor.u32 %v4539_v23, %v3542_v24  ;;  %v4531_v54 = vld [vmem:[#allocation2 + $0x42c] sm:$0xf]  ;;  %v4937_v2 = vld [vmem:[%s5129_s2] sm:$0xf] }
  0xac   :  { %v4463_v59 = vld [vmem:[#allocation2 + $0x20c] sm:$0xf]  ;;  %v3750_v1 = vld [vmem:[#allocation2 + $0x618] sm:$0xf0] }
  0xad   :  { %1516 = vmatpush.bf16.msrb.mxu3 %v3637_v18  ;;  %v3433_v18 = vor.u32 %v4511_v8, %v3430_v10  ;;  %v4563_v61 = vld [vmem:[#allocation2 + $0x52c] sm:$0xf] }
  0xae   :  { %1542 = vmatpush.bf16.msrb.mxu2 %v3001_v15  ;;  %1505 = vmatmul.bf16.vlgmr.msra.gmra.mxu1 %v4902_v30  ;;  %v3286_v15 = vld [vmem:[#allocation2 + $0x278] sm:$0xf0]  ;;  %v4926_v16 = vpop.f32.mrf.mxu0  ;;  %v4527_v10 = vld [vmem:[#allocation2 + $0x40c] sm:$0xf] }
  0xaf   :  { %1562 = vmatpush.bf16.msrb.mxu1 %v3353_v27  ;;  %1556 = vmatpush.bf16.msrb.mxu0 %v3113_v44  ;;  %v3289_v21 = vor.u32 %v4475_v14, %v3286_v15  ;;  %v3270_v27 = vld [vmem:[#allocation2 + $0x258] sm:$0xf0]  ;;  %v3872_v14 = vld [vmem:[#allocation4 + $0xe0] sm:$0xf]  ;;  %v4624_v15 = vld [vmem:[#allocation4 + $0xec] sm:$0xf0]  ;;  %v3497_v23 = vor.u32 %v4527_v10, %v3494_v11 }
  0xb0   :  { %v3273_v36 = vor.u32 %v4471_v26, %v3270_v27  ;;  %v3873_v24 = vor.u32 %v4624_v15, %v3872_v14  ;;  %v3856_v26 = vld [vmem:[#allocation4 + $0xc0] sm:$0xf]  ;;  %v4620_v27 = vld [vmem:[#allocation4 + $0xcc] sm:$0xf0] }
  0xb1   :  { %1517 = vmatpush.bf16.msrb.mxu3 %v3621_v37  ;;  %v3904_v11 = vld [vmem:[#allocation4 + $0x120] sm:$0xf]  ;;  %v4596_v15 = vld [vmem:[#allocation4 + $0xc] sm:$0xf0] }
  0xb2   :  { %1543 = vmatpush.bf16.msrb.mxu2 %v2985_v32  ;;  %1557 = vmatmul.bf16.vlgmr.msrb.gmra.mxu0 %v4885_v7  ;;  %v3417_v32 = vor.u32 %v4507_v20, %v3414_v22  ;;  %v4656_v20 = vld [vmem:[#allocation4 + $0x1ec] sm:$0xf0]  ;;  %v3760_v14 = vld [vmem:[#allocation4] sm:$0xf] }
  0xb3   :  { %1563 = vmatpush.bf16.msrb.mxu1 %v3337_v43  ;;  %1601 = vmatpush.bf16.msra.mxu0 %v3737_v49  ;;  %v4930_v31 = vpop.f32.mrf.mxu2  ;;  %v4932_v37 = vpop.f32.mrf.mxu3  ;;  %v3254_v43 = vld [vmem:[#allocation2 + $0x238] sm:$0xf0] }
  0xb4   :  { %1518 = vmatmul.bf16.vlgmr.msrb.gmra.mxu3 %v4904_v35  ;;  %v3257_v52 = vor.u32 %v4467_v42, %v3254_v43  ;;  %v1287_v62 = vpop.f32.mrf.mxu1  ;;  %v4648_v42 = vld [vmem:[#allocation4 + $0x1ac] sm:$0xf0] }
  0xb5   :  { %1575 = vmatpush.bf16.msra.mxu3 %v3481_v40  ;;  %1544 = vmatmul.bf16.vlgmr.msrb.gmra.mxu2 %v4876_v55  ;;  %v4575_v55 = vld [vmem:[#allocation2 + $0x58c] sm:$0xf]  ;;  %v3526_v40 = vld [vmem:[#allocation2 + $0x458] sm:$0xf0]  ;;  %v4604_v62 = vld [vmem:[#allocation4 + $0x4c] sm:$0xf0] }
  0xb6   :  { %1588 = vmatpush.bf16.msra.mxu2 %v3609_v41  ;;  %v3689_v7 = vor.u32 %v4575_v55, %v3686_v17  ;;  %v3673_v41 = vor.u32 %v4571_v28, %v3670_v29  ;;  %v1274_v44 = vpop.f32.mrf.mxu0  ;;  %v3529_v49 = vor.u32 %v4535_v39, %v3526_v40  ;;  %v4559_v55 = vld [vmem:[#allocation2 + $0x50c] sm:$0xf]  ;;  %v3984_v29 = vld [vmem:[#allocation4 + $0x1c0] sm:$0xf]  ;;  %v4616_v39 = vld [vmem:[#allocation4 + $0xac] sm:$0xf0] }
  0xb7   :  { %1564 = vmatpush.bf16.msrb.mxu1 %v3321_v60  ;;  %1602 = vmatpush.bf16.msra.mxu0 %v3721_v0  ;;  %v3238_v60 = vld [vmem:[#allocation2 + $0x218] sm:$0xf0]  ;;  %v4591_v0 = vld [vmem:[#allocation2 + $0x60c] sm:$0xf]  ;;  %v4612_v44 = vld [vmem:[#allocation4 + $0x8c] sm:$0xf0] }
  0xb8   :  { %v3241_v8 = vor.u32 %v4463_v59, %v3238_v60  ;;  %v3753_v17 = vor.u32 %v4591_v0, %v3750_v1  ;;  %v3920_v0 = vld [vmem:[#allocation4 + $0x140] sm:$0xf]  ;;  %v4636_v1 = vld [vmem:[#allocation4 + $0x14c] sm:$0xf0] }
  0xb9   :  { %1576 = vmatpush.bf16.msra.mxu3 %v3465_v56  ;;  %v3510_v56 = vld [vmem:[#allocation2 + $0x438] sm:$0xf0]  ;;  %v3921_v10 = vor.u32 %v4636_v1, %v3920_v0  ;;  %v4672_v0 = vld [vmem:[#allocation4 + $0x26c] sm:$0xf0]  ;;  %v272_v1 = vperm.slane %v4937_v2, 1 }
  0xba   :  { %1589 = vmatpush.bf16.msra.mxu2 %v3593_v58  ;;  %v3657_v58 = vor.u32 %v4567_v46, %v3654_v47 }
  0xbb   :  { %1565 = vmatpush.bf16.msrb.mxu1 %v3305_v9  ;;  %1603 = vmatpush.bf16.msra.mxu0 %v3705_v13  ;;  %v1300_v3 = vpop.f32.mrf.mxu2  ;;  %v3366_v9 = vld [vmem:[#allocation2 + $0x318] sm:$0xf0]  ;;  %v1313_v12 = vpop.f32.mrf.mxu3  ;;  %v3641_v13 = vor.u32 %v4563_v61, %v3638_v63  ;;  %v3792_v61 = vld [vmem:[#allocation4 + $0x40] sm:$0xf] }
  0xbc   :  { %v4632_v12 = vld [vmem:[#allocation4 + $0x12c] sm:$0xf0] }
  0xbd   :  { %1577 = vmatpush.bf16.msra.mxu3 %v3449_v5  ;;  %v3513_v5 = vor.u32 %v4531_v54, %v3510_v56  ;;  %v4608_v54 = vld [vmem:[#allocation4 + $0x6c] sm:$0xf0]  ;;  %v3936_v56 = vld [vmem:[#allocation4 + $0x160] sm:$0xf] }
  0xbe   :  { %1590 = vmatpush.bf16.msra.mxu2 %v3577_v6  ;;  %v4495_v6 = vld [vmem:[#allocation2 + $0x30c] sm:$0xf] }
  0xbf   :  { %1566 = vmatpush.bf16.msrb.mxu1 %v3289_v21  ;;  %1604 = vmatpush.bf16.msra.mxu0 %v3689_v7  ;;  %v271_v21 = vperm.slane %v4937_v2, 0  ;;  %v3369_v22 = vor.u32 %v4495_v6, %v3366_v9  ;;  %v4600_v9 = vld [vmem:[#allocation4 + $0x2c] sm:$0xf0] }
  0xc1   :  { %1578 = vmatpush.bf16.msra.mxu3 %v3433_v18  ;;  %v3622_v18 = vld [vmem:[#allocation2 + $0x518] sm:$0xf0] }
  0xc2   :  { %1591 = vmatpush.bf16.msra.mxu2 %v3561_v19  ;;  %v4000_v19 = vld [vmem:[#allocation4 + $0x1e0] sm:$0xf]  ;;  %v3625_v7 = vor.u32 %v4559_v55, %v3622_v18 }
  0xc3   :  { %1567 = vmatpush.bf16.msrb.mxu1 %v3273_v36  ;;  %1605 = vmatpush.bf16.msra.mxu0 %v3673_v41  ;;  %v4001_v28 = vor.u32 %v4656_v20, %v4000_v19  ;;  %v4942_v34 = vpop.f32.mrf.mxu2  ;;  %v3857_v36 = vor.u32 %v4620_v27, %v3856_v26  ;;  %v3968_v41 = vld [vmem:[#allocation4 + $0x1a0] sm:$0xf]  ;;  %v4688_v19 = vld [vmem:[#allocation4 + $0x2ec] sm:$0xf0]  ;;  %v4002_v26 = vld [vmem:[#allocation4 + $0x1f0] sm:$0xf0]  ;;  %v3761_v27 = vor.u32 %v4596_v15, %v3760_v14 }
  0xc4   :  { %v3969_v46 = vor.u32 %v4648_v42, %v3968_v41  ;;  %v4128_v18 = vld [vmem:[#allocation4 + $0x2e0] sm:$0xf]  ;;  %v4650_v42 = vld [vmem:[#allocation4 + $0x1c4] sm:$0xf] }
  0xc5   :  { %1579 = vmatpush.bf16.msra.mxu3 %v3417_v32  ;;  %v4652_v32 = vld [vmem:[#allocation4 + $0x1cc] sm:$0xf0]  ;;  %v4602_v15 = vld [vmem:[#allocation4 + $0x44] sm:$0xf] }
  0xc6   :  { %1592 = vmatpush.bf16.msra.mxu2 %v3545_v33  ;;  %v1273_v33 = vadd.f32 %v4926_v16, %v271_v21  ;;  %v3985_v40 = vor.u32 %v4652_v32, %v3984_v29  ;;  %v3824_v16 = vld [vmem:[#allocation4 + $0x80] sm:$0xf]  ;;  %v3874_v21 = vld [vmem:[#allocation4 + $0xf0] sm:$0xf0] }
  0xc7   :  { %1568 = vmatpush.bf16.msrb.mxu1 %v3257_v52  ;;  %1606 = vmatpush.bf16.msra.mxu0 %v3657_v58  ;;  %v3825_v53 = vor.u32 %v4612_v44, %v3824_v16  ;;  %v4096_v44 = vld [vmem:[#allocation4 + $0x2a0] sm:$0xf] }
  0xc8   :  { %v1286_v43 = vadd.f32 %v4928_v25, %v1273_v33  ;;  %v3808_v25 = vld [vmem:[#allocation4 + $0x60] sm:$0xf] }
  0xc9   :  { %1580 = vmatpush.bf16.msra.mxu3 %v3401_v48  ;;  %v3952_v48 = vld [vmem:[#allocation4 + $0x180] sm:$0xf]  ;;  %v3809_v59 = vor.u32 %v4608_v54, %v3808_v25  ;;  %v4676_v54 = vld [vmem:[#allocation4 + $0x28c] sm:$0xf0] }
  0xca   :  { %1593 = vmatpush.bf16.msra.mxu2 %v3529_v49  ;;  %v1324_v47 = vpop.f32.mrf.mxu0  ;;  %v4644_v49 = vld [vmem:[#allocation4 + $0x18c] sm:$0xf0]  ;;  %v1299_v50 = vadd.f32 %v4930_v31, %v1286_v43  ;;  %v3986_v43 = vld [vmem:[#allocation4 + $0x1d0] sm:$0xf0]  ;;  %v4080_v25 = vld [vmem:[#allocation4 + $0x280] sm:$0xf] }
  0xcb   :  { %1569 = vmatpush.bf16.msrb.mxu1 %v3241_v8  ;;  %1607 = vmatpush.bf16.msra.mxu0 %v3641_v13  ;;  %v1352_v52 = vpop.f32.mrf.mxu2  ;;  %v3776_v8 = vld [vmem:[#allocation4 + $0x20] sm:$0xf] }
  0xcc   :  { %v1312_v58 = vadd.f32 %v4932_v37, %v1299_v50  ;;  %v3777_v13 = vor.u32 %v4600_v9, %v3776_v8  ;;  %v3970_v52 = vld [vmem:[#allocation4 + $0x1b0] sm:$0xf0]  ;;  %v4638_v9 = vld [vmem:[#allocation4 + $0x164] sm:$0xf] }
  0xcd   :  { %1581 = vmatpush.bf16.msra.mxu3 %v3385_v4 }
  0xce   :  { %1594 = vmatpush.bf16.msra.mxu2 %v3513_v5  ;;  %1570 = vmatmul.bf16.vlgmr.msrb.gmra.mxu1 %v4874_v51  ;;  %v3841_v51 = vor.u32 %v4616_v39, %v3840_v38  ;;  %v1325_v60 = vadd.f32 %v1324_v47, %v1312_v58  ;;  %v3793_v5 = vor.u32 %v4604_v62, %v3792_v61  ;;  %v4618_v38 = vld [vmem:[#allocation4 + $0xc4] sm:$0xf]  ;;  %v3858_v39 = vld [vmem:[#allocation4 + $0xd0] sm:$0xf0] }
  0xcf   :  { %1621 = vmatpush.bf16.msra.mxu1 %v3753_v17  ;;  %1608 = vmatpush.bf16.msra.mxu0 %v3625_v7  ;;  %v3905_v17 = vor.u32 %v4632_v12, %v3904_v11  ;;  %v4654_v7 = vld [vmem:[#allocation4 + $0x1e4] sm:$0xf]  ;;  %v3861_v16 = vor.u32 %v4618_v38, %v3858_v39  ;;  %v4081_v58 = vor.u32 %v4676_v54, %v4080_v25  ;;  %v4048_v12 = vld [vmem:[#allocation4 + $0x240] sm:$0xf] }
  0xd0   :  { %v4614_v47 = vld [vmem:[#allocation4 + $0xa4] sm:$0xf] }
  0xd1   :  { %1582 = vmatpush.bf16.msra.mxu3 %v3369_v22  ;;  %v3888_v22 = vld [vmem:[#allocation4 + $0x100] sm:$0xf]  ;;  %v4594_v38 = vld [vmem:[#allocation4 + $0x4] sm:$0xf] }
  0xd2   :  { %1595 = vmatpush.bf16.msra.mxu2 %v3497_v23  ;;  %1609 = vmatmul.bf16.vlgmr.msra.gmra.mxu0 %v4904_v35  ;;  %v4640_v35 = vld [vmem:[#allocation4 + $0x16c] sm:$0xf0]  ;;  %v1326_v3 = vpop.f32.mrf.mxu0 }
  0xd3   :  { %2426 = vmatpush.bf16.msrb.mxu1 %v4001_v28  ;;  %v3937_v63 = vor.u32 %v4640_v35, %v3936_v56  ;;  %v4950_v31 = vpop.f32.mrf.mxu3  ;;  %v4628_v23 = vld [vmem:[#allocation4 + $0x10c] sm:$0xf0]  ;;  %v3826_v56 = vld [vmem:[#allocation4 + $0x90] sm:$0xf0] }
  0xd4   :  { %1583 = vmatmul.bf16.vlgmr.msra.gmra.mxu3 %v4878_v57  ;;  %v1337_v57 = vpop.f32.mrf.mxu1  ;;  %v3889_v33 = vor.u32 %v4628_v23, %v3888_v22  ;;  %v1364_v14 = vadd.f32 %v4950_v31, %v272_v1 }
  0xd5   :  { %2413 = vmatpush.bf16.msrb.mxu3 %v3873_v24  ;;  %1596 = vmatmul.bf16.vlgmr.msra.gmra.mxu2 %v4902_v30  ;;  %v3953_v30 = vor.u32 %v4644_v49, %v3952_v48  ;;  %v1338_v37 = vadd.f32 %v1337_v57, %v1325_v60  ;;  %v4129_v24 = vor.u32 %v4688_v19, %v4128_v18  ;;  %v3842_v48 = vld [vmem:[#allocation4 + $0xb0] sm:$0xf0]  ;;  %v4646_v57 = vld [vmem:[#allocation4 + $0x1a4] sm:$0xf] }
  0xd6   :  { %v3989_v49 = vor.u32 %v4650_v42, %v3986_v43  ;;  %v3973_v35 = vor.u32 %v4646_v57, %v3970_v52  ;;  %v3954_v60 = vld [vmem:[#allocation4 + $0x190] sm:$0xf0]  ;;  %v4634_v19 = vld [vmem:[#allocation4 + $0x144] sm:$0xf]  ;;  %v4660_v42 = vld [vmem:[#allocation4 + $0x20c] sm:$0xf0] }
  0xd7   :  { %2427 = vmatpush.bf16.msrb.mxu1 %v3985_v40  ;;  %v1351_v55 = vadd.f32 %v4942_v34, %v1338_v37  ;;  %2439 = vmatpush.bf16.msrb.mxu2 %v4129_v24  ;;  %v4112_v34 = vld [vmem:[#allocation4 + $0x2c0] sm:$0xf]  ;;  %v4005_v40 = vor.u32 %v4654_v7, %v4002_v26  ;;  %v4664_v7 = vld [vmem:[#allocation4 + $0x22c] sm:$0xf0]  ;;  %v3880_v43 = vld [vmem:[#allocation4 + $0xe8] sm:$0xf] }
  0xd8   :  { %v4954_v6 = vpop.f32.mrf.mxu2  ;;  %v4032_v24 = vld [vmem:[#allocation4 + $0x220] sm:$0xf] }
  0xd9   :  { %2414 = vmatpush.bf16.msrb.mxu3 %v3857_v36  ;;  %v1627_v29 = vmax.f32 %v1351_v55, 0.0  ;;  %v4684_v36 = vld [vmem:[#allocation4 + $0x2cc] sm:$0xf0]  ;;  %v3794_v55 = vld [vmem:[#allocation4 + $0x50] sm:$0xf0]  ;;  %v1377_v26 = vadd.f32 %v4954_v6, %v1364_v14 }
  0xda   :  { %v4113_v41 = vor.u32 %v4684_v36, %v4112_v34  ;;  %v3797_v23 = vor.u32 %v4602_v15, %v3794_v55  ;;  %v3906_v34 = vld [vmem:[#allocation4 + $0x130] sm:$0xf0]  ;;  %v4008_v14 = vld [vmem:[#allocation4 + $0x1e8] sm:$0xf]  ;;  %v4657_v15 = vld [vmem:[#allocation4 + $0x1f4] sm:$0xf0] }
  0xdb   :  { %2428 = vmatpush.bf16.msrb.mxu1 %v3969_v46  ;;  %v1365_v20 = vpop.f32.mrf.mxu3  ;;  %v4680_v46 = vld [vmem:[#allocation4 + $0x2ac] sm:$0xf0] }
  0xdc   :  { %v1339_v4 = vpop.f32.mrf.mxu1  ;;  %2440 = vmatpush.bf16.msrb.mxu2 %v4113_v41  ;;  %v4097_v50 = vor.u32 %v4680_v46, %v4096_v44  ;;  %v3922_v20 = vld [vmem:[#allocation4 + $0x150] sm:$0xf0]  ;;  %v4016_v41 = vld [vmem:[#allocation4 + $0x200] sm:$0xf]  ;;  %v4686_v44 = vld [vmem:[#allocation4 + $0x2e4] sm:$0xf] }
  0xdd   :  { %2415 = vmatpush.bf16.msrb.mxu3 %v3841_v51  ;;  %v4957_v51 = vpack.c.bf16 %v1627_v29, %v1627_v29  ;;  %v4606_v4 = vld [vmem:[#allocation4 + $0x64] sm:$0xf]  ;;  %v3925_v31 = vor.u32 %v4634_v19, %v3922_v20  ;;  %v4017_v6 = vor.u32 %v4660_v42, %v4016_v41  ;;  %v4130_v46 = vld [vmem:[#allocation4 + $0x2f0] sm:$0xf0]  ;;  %v4613_v19 = vld [vmem:[#allocation4 + $0x94] sm:$0xf0] }
  0xde   :  { %3757 = vmatmul.msk.bf16.vlgmr.msra.gmra.mxu1 %vm1259_vm0, %v4892_v45  ;;  %v4622_v45 = vld [vmem:[#allocation4 + $0xe4] sm:$0xf]  ;;  %v4133_v57 = vor.u32 %v4686_v44, %v4130_v46  ;;  %v4208_v42 = vld [vmem:[#allocation4 + $0x380] sm:$0xf] }
  0xdf   :  { %2429 = vmatpush.bf16.msrb.mxu1 %v3953_v30  ;;  %v3877_v32 = vor.u32 %v4622_v45, %v3874_v21  ;;  %v4610_v30 = vld [vmem:[#allocation4 + $0x84] sm:$0xf] }
  0xe0   :  { %v1378_v28 = vpop.f32.mrf.mxu2  ;;  %2441 = vmatpush.bf16.msrb.mxu2 %v4097_v50  ;;  %v3829_v62 = vor.u32 %v4610_v30, %v3826_v56  ;;  %v3890_v50 = vld [vmem:[#allocation4 + $0x110] sm:$0xf0]  ;;  %v3864_v56 = vld [vmem:[#allocation4 + $0xc8] sm:$0xf]  ;;  %v4674_v20 = vld [vmem:[#allocation4 + $0x284] sm:$0xf] }
  0xe1   :  { %2416 = vmatpush.bf16.msrb.mxu3 %v3825_v53  ;;  %v3845_v53 = vor.u32 %v4614_v47, %v3842_v48  ;;  %v3778_v28 = vld [vmem:[#allocation4 + $0x30] sm:$0xf0]  ;;  %v4625_v48 = vld [vmem:[#allocation4 + $0xf4] sm:$0xf0] }
  0xe2   :  { %v3881_v30 = vor.u32 %v4625_v48, %v3880_v43  ;;  %v4708_v43 = vld [vmem:[#allocation4 + $0x38c] sm:$0xf0]  ;;  %v3800_v48 = vld [vmem:[#allocation4 + $0x48] sm:$0xf] }
  0xe3   :  { %2430 = vmatpush.bf16.msrb.mxu1 %v3937_v63  ;;  %v4064_v63 = vld [vmem:[#allocation4 + $0x260] sm:$0xf]  ;;  %v4209_v44 = vor.u32 %v4708_v43, %v4208_v42  ;;  %v4718_v42 = vld [vmem:[#allocation4 + $0x3e4] sm:$0xf]  ;;  %v4258_v43 = vld [vmem:[#allocation4 + $0x3f0] sm:$0xf0] }
  0xe4   :  { %2442 = vmatpush.bf16.msrb.mxu2 %v4081_v58  ;;  %v4065_v8 = vor.u32 %v4672_v0, %v4064_v63  ;;  %v4682_v58 = vld [vmem:[#allocation4 + $0x2c4] sm:$0xf]  ;;  %v4720_v63 = vld [vmem:[#allocation4 + $0x3ec] sm:$0xf0] }
  0xe5   :  { %2417 = vmatpush.bf16.msrb.mxu3 %v3809_v59  ;;  %v4642_v59 = vld [vmem:[#allocation4 + $0x184] sm:$0xf] }
  0xe6   :  { %v3957_v37 = vor.u32 %v4642_v59, %v3954_v60  ;;  %v4114_v59 = vld [vmem:[#allocation4 + $0x2d0] sm:$0xf0]  ;;  %v4621_v60 = vld [vmem:[#allocation4 + $0xd4] sm:$0xf0] }
  0xe7   :  { %2431 = vmatpush.bf16.msrb.mxu1 %v3921_v10  ;;  %v3938_v10 = vld [vmem:[#allocation4 + $0x170] sm:$0xf0] }
  0xe8   :  { %2443 = vmatpush.bf16.msrb.mxu2 %v4065_v8  ;;  %v3941_v45 = vor.u32 %v4638_v9, %v3938_v10  ;;  %v4617_v9 = vld [vmem:[#allocation4 + $0xb4] sm:$0xf0] }
  0xe9   :  { %2418 = vmatpush.bf16.msrb.mxu3 %v3793_v5  ;;  %v3810_v5 = vld [vmem:[#allocation4 + $0x70] sm:$0xf0] }
  0xea   :  { %v1389_v61 = vpop.f32.mrf.mxu0  ;;  %v3813_v11 = vor.u32 %v4606_v4, %v3810_v5  ;;  %v3848_v4 = vld [vmem:[#allocation4 + $0xa8] sm:$0xf]  ;;  %v4678_v5 = vld [vmem:[#allocation4 + $0x2a4] sm:$0xf] }
  0xeb   :  { %2432 = vmatpush.bf16.msrb.mxu1 %v3905_v17  ;;  %v1390_v36 = vadd.f32 %v1389_v61, %v1377_v26  ;;  %v4117_v61 = vor.u32 %v4682_v58, %v4114_v59  ;;  %v3992_v26 = vld [vmem:[#allocation4 + $0x1c8] sm:$0xf] }
  0xec   :  { %v3784_v59 = vld [vmem:[#allocation4 + $0x28] sm:$0xf] }
  0xed   :  { %2419 = vmatpush.bf16.msrb.mxu3 %v3777_v13  ;;  %v1402_v3 = vpop.f32.mrf.mxu1  ;;  %v4668_v13 = vld [vmem:[#allocation4 + $0x24c] sm:$0xf0] }
  0xee   :  { %v4049_v17 = vor.u32 %v4668_v13, %v4048_v12  ;;  %v1403_v52 = vadd.f32 %v1402_v3, %v1390_v36  ;;  %v3865_v3 = vor.u32 %v4621_v60, %v3864_v56  ;;  %v4716_v12 = vld [vmem:[#allocation4 + $0x3cc] sm:$0xf0]  ;;  %v4645_v56 = vld [vmem:[#allocation4 + $0x194] sm:$0xf0]  ;;  %v4662_v60 = vld [vmem:[#allocation4 + $0x224] sm:$0xf] }
  0xef   :  { %2433 = vmatpush.bf16.msrb.mxu1 %v3889_v33  ;;  %v4630_v33 = vld [vmem:[#allocation4 + $0x124] sm:$0xf] }
  0xf0   :  { %2444 = vmatpush.bf16.msrb.mxu2 %v4049_v17 }
  0xf1   :  { %2420 = vmatpush.bf16.msrb.mxu3 %v3761_v27  ;;  %v4598_v27 = vld [vmem:[#allocation4 + $0x24] sm:$0xf] }
  0xf2   :  { %v1391_v21 = vpop.f32.mrf.mxu0  ;;  %v3781_v39 = vor.u32 %v4598_v27, %v3778_v28  ;;  %v4653_v27 = vld [vmem:[#allocation4 + $0x1d4] sm:$0xf0] }
  0xf3   :  { %2478 = vmatpush.bf16.msra.mxu1 %v4005_v40  ;;  %v1415_v18 = vpop.f32.mrf.mxu3  ;;  %v3762_v40 = vld [vmem:[#allocation4 + $0x10] sm:$0xf0]  ;;  %v4009_v21 = vor.u32 %v4657_v15, %v4008_v14  ;;  %v4597_v14 = vld [vmem:[#allocation4 + $0x14] sm:$0xf0]  ;;  %v4658_v15 = vld [vmem:[#allocation4 + $0x204] sm:$0xf] }
  0xf4   :  { %2421 = vmatmul.bf16.vlgmr.msrb.gmra.mxu3 %v4957_v51  ;;  %v1416_v54 = vadd.f32 %v1415_v18, %v1403_v52  ;;  %v3849_v18 = vor.u32 %v4617_v9, %v3848_v4  ;;  %v4605_v52 = vld [vmem:[#allocation4 + $0x54] sm:$0xf0]  ;;  %v4176_v4 = vld [vmem:[#allocation4 + $0x340] sm:$0xf] }
  0xf5   :  { %2465 = vmatpush.bf16.msra.mxu3 %v3877_v32  ;;  %v1404_v29 = vpop.f32.mrf.mxu1  ;;  %v4033_v32 = vor.u32 %v4664_v7, %v4032_v24  ;;  %v4712_v24 = vld [vmem:[#allocation4 + $0x3ac] sm:$0xf0]  ;;  %v3801_v58 = vor.u32 %v4605_v52, %v3800_v48  ;;  %v3850_v52 = vld [vmem:[#allocation4 + $0xb8] sm:$0xf0] }
  0xf7   :  { %2479 = vmatpush.bf16.msra.mxu1 %v3989_v49  ;;  %2445 = vmatpush.bf16.msrb.mxu2 %v4033_v32  ;;  %v4626_v49 = vld [vmem:[#allocation4 + $0x104] sm:$0xf]  ;;  %v3816_v32 = vld [vmem:[#allocation4 + $0x68] sm:$0xf] }
  0xf8   :  { %v1428_v22 = vpop.f32.mrf.mxu2 }
  0xf9   :  { %2466 = vmatpush.bf16.msra.mxu3 %v3861_v16  ;;  %v3909_v16 = vor.u32 %v4630_v33, %v3906_v34  ;;  %v1429_v1 = vadd.f32 %v1428_v22, %v1416_v54  ;;  %v4082_v22 = vld [vmem:[#allocation4 + $0x290] sm:$0xf0]  ;;  %v4670_v33 = vld [vmem:[#allocation4 + $0x264] sm:$0xf]  ;;  %v4704_v54 = vld [vmem:[#allocation4 + $0x36c] sm:$0xf0] }
  0xfa   :  { %v4085_v28 = vor.u32 %v4674_v20, %v4082_v22  ;;  %v4066_v34 = vld [vmem:[#allocation4 + $0x270] sm:$0xf0]  ;;  %v4696_v20 = vld [vmem:[#allocation4 + $0x32c] sm:$0xf0]  ;;  %v4623_v22 = vld [vmem:[#allocation4 + $0xec] sm:$0xf] }
  0xfb   :  { %2480 = vmatpush.bf16.msra.mxu1 %v3973_v35  ;;  %v1417_v47 = vpop.f32.mrf.mxu3  ;;  %2446 = vmatpush.bf16.msrb.mxu2 %v4017_v6  ;;  %v3893_v35 = vor.u32 %v4626_v49, %v3890_v50  ;;  %v4069_v41 = vor.u32 %v4670_v33, %v4066_v34  ;;  %v4649_v6 = vld [vmem:[#allocation4 + $0x1b4] sm:$0xf0]  ;;  %v4666_v49 = vld [vmem:[#allocation4 + $0x244] sm:$0xf]  ;;  %v4050_v50 = vld [vmem:[#allocation4 + $0x250] sm:$0xf0] }
  0xfd   :  { %2467 = vmatpush.bf16.msra.mxu3 %v3845_v53  ;;  %v3765_v53 = vor.u32 %v4594_v38, %v3762_v40  ;;  %v4609_v40 = vld [vmem:[#allocation4 + $0x74] sm:$0xf0] }
  0xfe   :  { %v3817_v47 = vor.u32 %v4609_v40, %v3816_v32  ;;  %v4619_v32 = vld [vmem:[#allocation4 + $0xcc] sm:$0xf]  ;;  %v3866_v40 = vld [vmem:[#allocation4 + $0xd8] sm:$0xf0] }
  0xff   :  { %2481 = vmatpush.bf16.msra.mxu1 %v3957_v37  ;;  %2491 = vmatpush.bf16.msra.mxu2 %v4133_v57  ;;  %v4098_v37 = vld [vmem:[#allocation4 + $0x2b0] sm:$0xf0]  ;;  %v3869_v48 = vor.u32 %v4619_v32, %v3866_v40  ;;  %v3786_v40 = vld [vmem:[#allocation4 + $0x38] sm:$0xf0] }
 0x100   :  { %v1430_v25 = vpop.f32.mrf.mxu2  ;;  %v4101_v10 = vor.u32 %v4678_v5, %v4098_v37  ;;  %v4700_v5 = vld [vmem:[#allocation4 + $0x34c] sm:$0xf0]  ;;  %v3944_v37 = vld [vmem:[#allocation4 + $0x168] sm:$0xf] }
 0x101   :  { %2468 = vmatpush.bf16.msra.mxu3 %v3829_v62  ;;  %v4256_v62 = vld [vmem:[#allocation4 + $0x3e0] sm:$0xf]  ;;  %v4177_v9 = vor.u32 %v4700_v5, %v4176_v4  ;;  %v4651_v5 = vld [vmem:[#allocation4 + $0x1cc] sm:$0xf] }
 0x102   :  { %v4257_v0 = vor.u32 %v4720_v63, %v4256_v62  ;;  %v4192_v25 = vld [vmem:[#allocation4 + $0x360] sm:$0xf] }
 0x103   :  { %2482 = vmatpush.bf16.msra.mxu1 %v3941_v45  ;;  %2492 = vmatpush.bf16.msra.mxu2 %v4117_v61  ;;  %v1441_v8 = vpop.f32.mrf.mxu3  ;;  %v3832_v45 = vld [vmem:[#allocation4 + $0x88] sm:$0xf]  ;;  %v4034_v61 = vld [vmem:[#allocation4 + $0x230] sm:$0xf0] }
 0x104   :  { %2452 = vmatpush.bf16.msrb.mxu0 %v4257_v0  ;;  %v1442_v13 = vadd.f32 %v1441_v8, %v1429_v1  ;;  %v3833_v29 = vor.u32 %v4613_v19, %v3832_v45  ;;  %v4601_v1 = vld [vmem:[#allocation4 + $0x34] sm:$0xf0]  ;;  %v4160_v19 = vld [vmem:[#allocation4 + $0x320] sm:$0xf] }
 0x105   :  { %2469 = vmatpush.bf16.msra.mxu3 %v3813_v11  ;;  %v4240_v11 = vld [vmem:[#allocation4 + $0x3c0] sm:$0xf]  ;;  %v4641_v8 = vld [vmem:[#allocation4 + $0x174] sm:$0xf0] }
 0x106   :  { %v4241_v55 = vor.u32 %v4716_v12, %v4240_v11  ;;  %v1628_v17 = vmax.f32 %v1442_v13, 0.0  ;;  %v3768_v11 = vld [vmem:[#allocation4 + $0x8] sm:$0xf]  ;;  %v3785_v13 = vor.u32 %v4601_v1, %v3784_v59  ;;  %v3945_v45 = vor.u32 %v4641_v8, %v3944_v37  ;;  %v4710_v1 = vld [vmem:[#allocation4 + $0x3a4] sm:$0xf] }
 0x107   :  { %2483 = vmatpush.bf16.msra.mxu1 %v3925_v31  ;;  %2493 = vmatpush.bf16.msra.mxu2 %v4101_v10 }
 0x108   :  { %2453 = vmatpush.bf16.msrb.mxu0 %v4241_v55  ;;  %v4964_v7 = vpack.c.bf16 %v1628_v17, %v1628_v17  ;;  %v4018_v55 = vld [vmem:[#allocation4 + $0x210] sm:$0xf0]  ;;  %v3928_v17 = vld [vmem:[#allocation4 + $0x148] sm:$0xf] }
 0x109   :  { %2470 = vmatpush.bf16.msra.mxu3 %v3797_v23  ;;  %v4224_v23 = vld [vmem:[#allocation4 + $0x3a0] sm:$0xf] }
 0x10a   :  { %v4225_v31 = vor.u32 %v4712_v24, %v4224_v23  ;;  %2434 = vmatmul.bf16.vlgmr.msrb.gmra.mxu1 %v4964_v7  ;;  %v4967_v38 = vpop.f32.mrf.mxu0  ;;  %v3882_v23 = vld [vmem:[#allocation4 + $0xf8] sm:$0xf0]  ;;  %v4161_v24 = vor.u32 %v4696_v20, %v4160_v19  ;;  %v4603_v19 = vld [vmem:[#allocation4 + $0x4c] sm:$0xf] }
 0x10b   :  { %2484 = vmatpush.bf16.msra.mxu1 %v3909_v16  ;;  %v1443_v36 = vpop.f32.mrf.mxu3  ;;  %2494 = vmatpush.bf16.msra.mxu2 %v4085_v28  ;;  %v3976_v16 = vld [vmem:[#allocation4 + $0x1a8] sm:$0xf]  ;;  %v4633_v28 = vld [vmem:[#allocation4 + $0x134] sm:$0xf0] }
 0x10c   :  { %2454 = vmatpush.bf16.msrb.mxu0 %v4225_v31  ;;  %v3977_v57 = vor.u32 %v4649_v6, %v3976_v16  ;;  %v4144_v36 = vld [vmem:[#allocation4 + $0x300] sm:$0xf]  ;;  %v273_v16 = vperm.slane %v4937_v2, 2 }
 0x10d   :  { %2471 = vmatpush.bf16.msra.mxu3 %v3781_v39  ;;  %v3993_v39 = vor.u32 %v4653_v27, %v3992_v26  ;;  %v4969_v46 = vpop.f32.mrf.mxu1  ;;  %v3769_v26 = vor.u32 %v4597_v14, %v3768_v11  ;;  %v3912_v27 = vld [vmem:[#allocation4 + $0x128] sm:$0xf]  ;;  %v4607_v11 = vld [vmem:[#allocation4 + $0x6c] sm:$0xf]  ;;  %v4706_v14 = vld [vmem:[#allocation4 + $0x384] sm:$0xf] }
 0x10f   :  { %2485 = vmatpush.bf16.msra.mxu1 %v3893_v35  ;;  %2495 = vmatpush.bf16.msra.mxu2 %v4069_v41  ;;  %v4193_v35 = vor.u32 %v4704_v54, %v4192_v25  ;;  %v4242_v25 = vld [vmem:[#allocation4 + $0x3d0] sm:$0xf0]  ;;  %v1455_v54 = vadd.f32 %v4969_v46, %v273_v16  ;;  %v3994_v46 = vld [vmem:[#allocation4 + $0x1d8] sm:$0xf0]  ;;  %v4639_v16 = vld [vmem:[#allocation4 + $0x16c] sm:$0xf] }
 0x110   :  { %2455 = vmatpush.bf16.msrb.mxu0 %v4209_v44  ;;  %v4261_v44 = vor.u32 %v4718_v42, %v4258_v43  ;;  %v4178_v42 = vld [vmem:[#allocation4 + $0x350] sm:$0xf0] }
 0x111   :  { %2472 = vmatpush.bf16.msra.mxu3 %v3765_v53  ;;  %v4053_v53 = vor.u32 %v4666_v49, %v4050_v50  ;;  %v3896_v49 = vld [vmem:[#allocation4 + $0x108] sm:$0xf]  ;;  %v4629_v50 = vld [vmem:[#allocation4 + $0x114] sm:$0xf0] }
 0x112   :  { %v1482_v63 = vpop.f32.mrf.mxu0 }
 0x113   :  { %2530 = vmatpush.bf16.msrb.mxu1 %v4009_v21  ;;  %2496 = vmatpush.bf16.msra.mxu2 %v4053_v53  ;;  %v4637_v21 = vld [vmem:[#allocation4 + $0x154] sm:$0xf0]  ;;  %v4714_v53 = vld [vmem:[#allocation4 + $0x3c4] sm:$0xf] }
 0x114   :  { %2473 = vmatmul.bf16.vlgmr.msra.gmra.mxu3 %v4957_v51  ;;  %2456 = vmatpush.bf16.msrb.mxu0 %v4193_v35  ;;  %v3929_v31 = vor.u32 %v4637_v21, %v3928_v17  ;;  %v4245_v35 = vor.u32 %v4714_v53, %v4242_v25  ;;  %v3978_v17 = vld [vmem:[#allocation4 + $0x1b8] sm:$0xf0]  ;;  %v4694_v25 = vld [vmem:[#allocation4 + $0x324] sm:$0xf] }
 0x115   :  { %2517 = vmatpush.bf16.msrb.mxu3 %v3881_v30  ;;  %v3960_v30 = vld [vmem:[#allocation4 + $0x188] sm:$0xf]  ;;  %v1456_v12 = vpop.f32.mrf.mxu1  ;;  %v3802_v21 = vld [vmem:[#allocation4 + $0x58] sm:$0xf0] }
 0x116   :  { %v3961_v0 = vor.u32 %v4645_v56, %v3960_v30  ;;  %v4655_v30 = vld [vmem:[#allocation4 + $0x1ec] sm:$0xf]  ;;  %v4010_v56 = vld [vmem:[#allocation4 + $0x1f8] sm:$0xf0]  ;;  %v3997_v12 = vor.u32 %v4651_v5, %v3994_v46  ;;  %v4146_v5 = vld [vmem:[#allocation4 + $0x310] sm:$0xf0] }
 0x117   :  { %2531 = vmatpush.bf16.msrb.mxu1 %v3993_v39  ;;  %v4971_v62 = vpop.f32.mrf.mxu3  ;;  %v4692_v39 = vld [vmem:[#allocation4 + $0x30c] sm:$0xf0]  ;;  %v4013_v63 = vor.u32 %v4655_v30, %v4010_v56  ;;  %v3770_v53 = vld [vmem:[#allocation4 + $0x18] sm:$0xf0]  ;;  %v4635_v56 = vld [vmem:[#allocation4 + $0x14c] sm:$0xf] }
 0x118   :  { %v4973_v10 = vpop.f32.mrf.mxu2  ;;  %2457 = vmatpush.bf16.msrb.mxu0 %v4177_v9  ;;  %v4145_v41 = vor.u32 %v4692_v39, %v4144_v36  ;;  %v1468_v4 = vadd.f32 %v4971_v62, %v1455_v54  ;;  %v4162_v54 = vld [vmem:[#allocation4 + $0x330] sm:$0xf0]  ;;  %v4631_v46 = vld [vmem:[#allocation4 + $0x12c] sm:$0xf] }
 0x119   :  { %2518 = vmatpush.bf16.msrb.mxu3 %v3865_v3  ;;  %v4037_v3 = vor.u32 %v4662_v60, %v4034_v61  ;;  %v4611_v60 = vld [vmem:[#allocation4 + $0x8c] sm:$0xf] }
 0x11a   :  { %2486 = vmatmul.bf16.vlgmr.msra.gmra.mxu1 %v4964_v7  ;;  %v4976_v34 = vpop.f32.mrf.mxu0 }
 0x11b   :  { %2532 = vmatpush.bf16.msrb.mxu1 %v3977_v57  ;;  %2497 = vmatpush.bf16.msra.mxu2 %v4037_v3  ;;  %v4615_v57 = vld [vmem:[#allocation4 + $0xac] sm:$0xf]  ;;  %v4226_v3 = vld [vmem:[#allocation4 + $0x3b0] sm:$0xf0] }
 0x11c   :  { %2458 = vmatpush.bf16.msrb.mxu0 %v4161_v24  ;;  %v3853_v59 = vor.u32 %v4615_v57, %v3850_v52  ;;  %v4229_v37 = vor.u32 %v4710_v1, %v4226_v3  ;;  %v4595_v57 = vld [vmem:[#allocation4 + $0xc] sm:$0xf] }
 0x11d   :  { %2519 = vmatpush.bf16.msrb.mxu3 %v3849_v18  ;;  %v4021_v18 = vor.u32 %v4658_v15, %v4018_v55  ;;  %v4210_v15 = vld [vmem:[#allocation4 + $0x390] sm:$0xf0]  ;;  %v1481_v55 = vadd.f32 %v4967_v38, %v1468_v4  ;;  %v4690_v4 = vld [vmem:[#allocation4 + $0x304] sm:$0xf] }
 0x11e   :  { %v4213_v62 = vor.u32 %v4706_v14, %v4210_v15  ;;  %v4627_v15 = vld [vmem:[#allocation4 + $0x10c] sm:$0xf] }
 0x11f   :  { %2533 = vmatpush.bf16.msrb.mxu1 %v3961_v0  ;;  %v1469_v33 = vpop.f32.mrf.mxu3  ;;  %2498 = vmatpush.bf16.msra.mxu2 %v4021_v18  ;;  %v3834_v0 = vld [vmem:[#allocation4 + $0x98] sm:$0xf0]  ;;  %v1494_v24 = vadd.f32 %v4973_v10, %v1481_v55 }
 0x120   :  { %v1495_v6 = vpop.f32.mrf.mxu2  ;;  %2459 = vmatpush.bf16.msrb.mxu0 %v4145_v41  ;;  %v3837_v9 = vor.u32 %v4611_v60, %v3834_v0  ;;  %v4599_v33 = vld [vmem:[#allocation4 + $0x2c] sm:$0xf]  ;;  %v4698_v41 = vld [vmem:[#allocation4 + $0x344] sm:$0xf]  ;;  %v3946_v10 = vld [vmem:[#allocation4 + $0x178] sm:$0xf0] }
 0x121   :  { %2520 = vmatpush.bf16.msrb.mxu3 %v3833_v29  ;;  %v3885_v29 = vor.u32 %v4623_v22, %v3882_v23  ;;  %v4702_v22 = vld [vmem:[#allocation4 + $0x364] sm:$0xf]  ;;  %v4194_v23 = vld [vmem:[#allocation4 + $0x370] sm:$0xf0]  ;;  %v3949_v52 = vor.u32 %v4639_v16, %v3946_v10  ;;  %v4685_v0 = vld [vmem:[#allocation4 + $0x2d4] sm:$0xf0] }
 0x122   :  { %v1534_v61 = vpop.f32.mrf.mxu0  ;;  %v4197_v38 = vor.u32 %v4702_v22, %v4194_v23  ;;  %v3898_v55 = vld [vmem:[#allocation4 + $0x118] sm:$0xf0]  ;;  %v4673_v22 = vld [vmem:[#allocation4 + $0x274] sm:$0xf0]  ;;  %v4687_v10 = vld [vmem:[#allocation4 + $0x2ec] sm:$0xf] }
 0x123   :  { %2534 = vmatpush.bf16.msrb.mxu1 %v3945_v45  ;;  %v4647_v45 = vld [vmem:[#allocation4 + $0x1ac] sm:$0xf] }
 0x124   :  { %2504 = vmatpush.bf16.msra.mxu0 %v4261_v44  ;;  %v3981_v20 = vor.u32 %v4647_v45, %v3978_v17  ;;  %v4181_v44 = vor.u32 %v4698_v41, %v4178_v42  ;;  %v4088_v17 = vld [vmem:[#allocation4 + $0x288] sm:$0xf] }
 0x125   :  { %2521 = vmatpush.bf16.msrb.mxu3 %v3817_v47  ;;  %v3913_v47 = vor.u32 %v4633_v28, %v3912_v27  ;;  %v3962_v27 = vld [vmem:[#allocation4 + $0x198] sm:$0xf0] }
 0x127   :  { %2535 = vmatpush.bf16.msrb.mxu1 %v3929_v31 }
 0x128   :  { %2505 = vmatpush.bf16.msra.mxu0 %v4245_v35  ;;  %v3930_v35 = vld [vmem:[#allocation4 + $0x158] sm:$0xf0] }
 0x129   :  { %2522 = vmatpush.bf16.msrb.mxu3 %v3801_v58  ;;  %v3897_v58 = vor.u32 %v4629_v50, %v3896_v49  ;;  %v4136_v49 = vld [vmem:[#allocation4 + $0x2e8] sm:$0xf]  ;;  %v4689_v50 = vld [vmem:[#allocation4 + $0x2f4] sm:$0xf0]  ;;  %v3933_v1 = vor.u32 %v4635_v56, %v3930_v35 }
 0x12a   :  { %v4137_v60 = vor.u32 %v4689_v50, %v4136_v49  ;;  %v4683_v50 = vld [vmem:[#allocation4 + $0x2cc] sm:$0xf] }
 0x12b   :  { %2536 = vmatpush.bf16.msrb.mxu1 %v3913_v47  ;;  %v1506_v8 = vpop.f32.mrf.mxu1 }
 0x12c   :  { %2506 = vmatpush.bf16.msra.mxu0 %v4229_v37  ;;  %v1507_v31 = vadd.f32 %v1506_v8, %v1494_v24  ;;  %v3914_v37 = vld [vmem:[#allocation4 + $0x138] sm:$0xf0] }
 0x12d   :  { %2523 = vmatpush.bf16.msrb.mxu3 %v3785_v13  ;;  %v3818_v13 = vld [vmem:[#allocation4 + $0x78] sm:$0xf0]  ;;  %v3917_v14 = vor.u32 %v4631_v46, %v3914_v37  ;;  %v4232_v37 = vld [vmem:[#allocation4 + $0x3a8] sm:$0xf] }
 0x12e   :  { %v3821_v18 = vor.u32 %v4607_v11, %v3818_v13  ;;  %v4681_v13 = vld [vmem:[#allocation4 + $0x2b4] sm:$0xf0]  ;;  %v4090_v46 = vld [vmem:[#allocation4 + $0x298] sm:$0xf0] }
 0x12f   :  { %2537 = vmatpush.bf16.msrb.mxu1 %v3897_v58  ;;  %v4985_v28 = vpop.f32.mrf.mxu0 }
 0x130   :  { %2507 = vmatpush.bf16.msra.mxu0 %v4213_v62  ;;  %v4677_v62 = vld [vmem:[#allocation4 + $0x294] sm:$0xf0] }
 0x131   :  { %2524 = vmatpush.bf16.msrb.mxu3 %v3769_v26  ;;  %v4643_v26 = vld [vmem:[#allocation4 + $0x18c] sm:$0xf] }
 0x132   :  { %2538 = vmatmul.bf16.vlgmr.msrb.gmra.mxu1 %v4964_v7  ;;  %v3965_v39 = vor.u32 %v4643_v26, %v3962_v27  ;;  %v4056_v27 = vld [vmem:[#allocation4 + $0x248] sm:$0xf] }
 0x133   :  { %2582 = vmatpush.bf16.msra.mxu1 %v4013_v63  ;;  %v1508_v32 = vpop.f32.mrf.mxu1  ;;  %v4120_v63 = vld [vmem:[#allocation4 + $0x2c8] sm:$0xf] }
 0x134   :  { %2525 = vmatmul.bf16.vlgmr.msrb.gmra.mxu3 %v4957_v51  ;;  %2508 = vmatpush.bf16.msra.mxu0 %v4197_v38  ;;  %v4121_v11 = vor.u32 %v4685_v0, %v4120_v63  ;;  %v4665_v32 = vld [vmem:[#allocation4 + $0x234] sm:$0xf0]  ;;  %v4248_v63 = vld [vmem:[#allocation4 + $0x3c8] sm:$0xf] }
 0x135   :  { %2569 = vmatpush.bf16.msra.mxu3 %v3885_v29  ;;  %v3805_v29 = vor.u32 %v4603_v19, %v3802_v21  ;;  %v3901_v19 = vor.u32 %v4627_v15, %v3898_v55  ;;  %v4072_v21 = vld [vmem:[#allocation4 + $0x268] sm:$0xf]  ;;  %v4717_v0 = vld [vmem:[#allocation4 + $0x3d4] sm:$0xf0] }
 0x136   :  { %v4073_v26 = vor.u32 %v4673_v22, %v4072_v21  ;;  %v4709_v15 = vld [vmem:[#allocation4 + $0x394] sm:$0xf0]  ;;  %v4663_v22 = vld [vmem:[#allocation4 + $0x22c] sm:$0xf] }
 0x137   :  { %2583 = vmatpush.bf16.msra.mxu1 %v3997_v12  ;;  %v1519_v36 = vpop.f32.mrf.mxu3  ;;  %v1560_v58 = vpop.f32.mrf.mxu0  ;;  %v4104_v12 = vld [vmem:[#allocation4 + $0x2a8] sm:$0xf] }
 0x138   :  { %v1520_v43 = vadd.f32 %v1519_v36, %v1507_v31  ;;  %v1545_v6 = vpop.f32.mrf.mxu2  ;;  %2509 = vmatpush.bf16.msra.mxu0 %v4181_v44  ;;  %v4105_v45 = vor.u32 %v4681_v13, %v4104_v12  ;;  %v4671_v12 = vld [vmem:[#allocation4 + $0x26c] sm:$0xf]  ;;  %v4074_v13 = vld [vmem:[#allocation4 + $0x278] sm:$0xf0] }
 0x139   :  { %2570 = vmatpush.bf16.msra.mxu3 %v3869_v48  ;;  %v3789_v48 = vor.u32 %v4599_v33, %v3786_v40  ;;  %v4077_v55 = vor.u32 %v4671_v12, %v4074_v13 }
 0x13a   :  { %v1533_v47 = vadd.f32 %v4976_v34, %v1520_v43  ;;  %v3773_v34 = vor.u32 %v4595_v57, %v3770_v53  ;;  %v4024_v43 = vld [vmem:[#allocation4 + $0x208] sm:$0xf]  ;;  %v4122_v57 = vld [vmem:[#allocation4 + $0x2d8] sm:$0xf0] }
 0x13b   :  { %2584 = vmatpush.bf16.msra.mxu1 %v3981_v20  ;;  %v4089_v20 = vor.u32 %v4677_v62, %v4088_v17  ;;  %v4125_v35 = vor.u32 %v4683_v50, %v4122_v57  ;;  %v4667_v17 = vld [vmem:[#allocation4 + $0x24c] sm:$0xf]  ;;  %v4058_v62 = vld [vmem:[#allocation4 + $0x258] sm:$0xf0]  ;;  %v5006_v57 = vld [vmem:[%s5131_s4] sm:$0xf] }
 0x13c   :  { %v1629_v30 = vmax.f32 %v1533_v47, 0.0  ;;  %v4218_v50 = vld [vmem:[#allocation4 + $0x398] sm:$0xf0] }
 0x13d   :  { %2571 = vmatpush.bf16.msra.mxu3 %v3853_v59  ;;  %v4165_v59 = vor.u32 %v4694_v25, %v4162_v54  ;;  %v4264_v25 = vld [vmem:[#allocation4 + $0x3e8] sm:$0xf]  ;;  %v4721_v54 = vld [vmem:[#allocation4 + $0x3f4] sm:$0xf0] }
 0x13e   :  { %v4988_v61 = vpack.c.bf16 %v1629_v30, %v1629_v30  ;;  %v4265_v58 = vor.u32 %v4721_v54, %v4264_v25  ;;  %v4202_v25 = vld [vmem:[#allocation4 + $0x378] sm:$0xf0] }
 0x13f   :  { %2585 = vmatpush.bf16.msra.mxu1 %v3965_v39  ;;  %v1521_v3 = vpop.f32.mrf.mxu3  ;;  %2510 = vmatpush.bf16.msra.mxu0 %v4165_v59  ;;  %v4679_v59 = vld [vmem:[#allocation4 + $0x2ac] sm:$0xf] }
 0x140   :  { %2447 = vmatmul.bf16.vlgmr.msrb.gmra.mxu2 %v4988_v61  ;;  %v1547_v8 = vpop.f32.mrf.mxu2 }
 0x141   :  { %2572 = vmatpush.bf16.msra.mxu3 %v3837_v9  ;;  %v4149_v9 = vor.u32 %v4690_v4, %v4146_v5  ;;  %2543 = vmatpush.bf16.msrb.mxu2 %v4137_v60  ;;  %v4106_v60 = vld [vmem:[#allocation4 + $0x2b8] sm:$0xf0]  ;;  %v4249_v4 = vor.u32 %v4717_v0, %v4248_v63  ;;  %v4675_v5 = vld [vmem:[#allocation4 + $0x28c] sm:$0xf]  ;;  %v4713_v8 = vld [vmem:[#allocation4 + $0x3b4] sm:$0xf0] }
 0x142   :  { %v4695_v0 = vld [vmem:[#allocation4 + $0x32c] sm:$0xf] }
 0x143   :  { %2586 = vmatpush.bf16.msra.mxu1 %v3949_v52  ;;  %2511 = vmatpush.bf16.msra.mxu0 %v4149_v9  ;;  %v4093_v9 = vor.u32 %v4675_v5, %v4090_v46  ;;  %v4154_v5 = vld [vmem:[#allocation4 + $0x318] sm:$0xf0] }
 0x145   :  { %2573 = vmatpush.bf16.msra.mxu3 %v3821_v18  ;;  %2544 = vmatpush.bf16.msrb.mxu2 %v4121_v11  ;;  %v274_v18 = vperm.slane %v4937_v2, 3  ;;  %v4233_v11 = vor.u32 %v4713_v8, %v4232_v37 }
 0x147   :  { %2587 = vmatpush.bf16.msra.mxu1 %v3933_v1  ;;  %v1546_v23 = vadd.f32 %v1545_v6, %v274_v18  ;;  %v4138_v6 = vld [vmem:[#allocation4 + $0x2f8] sm:$0xf0]  ;;  %v4109_v1 = vor.u32 %v4679_v59, %v4106_v60  ;;  %v4200_v18 = vld [vmem:[#allocation4 + $0x368] sm:$0xf] }
 0x149   :  { %2574 = vmatpush.bf16.msra.mxu3 %v3805_v29  ;;  %2545 = vmatpush.bf16.msrb.mxu2 %v4105_v45  ;;  %v1559_v38 = vadd.f32 %v4985_v28, %v1546_v23  ;;  %v4040_v29 = vld [vmem:[#allocation4 + $0x228] sm:$0xf]  ;;  %v4042_v23 = vld [vmem:[#allocation4 + $0x238] sm:$0xf0] }
 0x14a   :  { %v4041_v42 = vor.u32 %v4665_v32, %v4040_v29  ;;  %v4168_v29 = vld [vmem:[#allocation4 + $0x328] sm:$0xf]  ;;  %v4697_v32 = vld [vmem:[#allocation4 + $0x334] sm:$0xf0] }
 0x14b   :  { %2588 = vmatpush.bf16.msra.mxu1 %v3917_v14  ;;  %v1571_v24 = vpop.f32.mrf.mxu1  ;;  %v4216_v14 = vld [vmem:[#allocation4 + $0x388] sm:$0xf] }
 0x14c   :  { %v1572_v33 = vadd.f32 %v1571_v24, %v1559_v38  ;;  %v4217_v45 = vor.u32 %v4709_v15, %v4216_v14  ;;  %v4184_v24 = vld [vmem:[#allocation4 + $0x348] sm:$0xf]  ;;  %v4729_v14 = vld [vmem:[%s5132_s5 + $0x38] sm:$0xff] }
 0x14d   :  { %2575 = vmatpush.bf16.msra.mxu3 %v3789_v48  ;;  %2546 = vmatpush.bf16.msrb.mxu2 %v4089_v20  ;;  %v4141_v48 = vor.u32 %v4687_v10, %v4138_v6  ;;  %v4061_v20 = vor.u32 %v4667_v17, %v4058_v62  ;;  %v4715_v10 = vld [vmem:[#allocation4 + $0x3cc] sm:$0xf]  ;;  %v4250_v6 = vld [vmem:[#allocation4 + $0x3d8] sm:$0xf0] }
 0x14f   :  { %2589 = vmatpush.bf16.msra.mxu1 %v3901_v19  ;;  %v1610_v2 = vpop.f32.mrf.mxu0  ;;  %v4705_v19 = vld [vmem:[#allocation4 + $0x374] sm:$0xf0] }
 0x150   :  { %2499 = vmatmul.bf16.vlgmr.msra.gmra.mxu2 %v4988_v61  ;;  %v4201_v21 = vor.u32 %v4705_v19, %v4200_v18  ;;  %v4727_v18 = vld [vmem:[%s5132_s5 + $0x28] sm:$0xff] }
 0x151   :  { %2576 = vmatpush.bf16.msra.mxu3 %v3773_v34  ;;  %2547 = vmatpush.bf16.msrb.mxu2 %v4073_v26  ;;  %v4701_v26 = vld [vmem:[#allocation4 + $0x354] sm:$0xf0] }
 0x152   :  { %2590 = vmatmul.bf16.vlgmr.msra.gmra.mxu1 %v4964_v7  ;;  %v4661_v7 = vld [vmem:[#allocation4 + $0x214] sm:$0xf0]  ;;  %v4185_v38 = vor.u32 %v4701_v26, %v4184_v24  ;;  %v4724_v26 = vld [vmem:[%s5132_s5 + $0x10] sm:$0xff] }
 0x153   :  { %v1573_v36 = vpop.f32.mrf.mxu1  ;;  %v4025_v47 = vor.u32 %v4661_v7, %v4024_v43  ;;  %v4266_v43 = vld [vmem:[#allocation4 + $0x3f8] sm:$0xf0] }
 0x154   :  { %2577 = vmatmul.bf16.vlgmr.msra.gmra.mxu3 %v4957_v51  ;;  %v4669_v51 = vld [vmem:[#allocation4 + $0x254] sm:$0xf0]  ;;  %v4169_v36 = vor.u32 %v4697_v32, %v4168_v29  ;;  %v1768_v32 = vperm.slane %v5006_v57, 3 }
 0x155   :  { %v4057_v31 = vor.u32 %v4669_v51, %v4056_v27  ;;  %v4045_v51 = vor.u32 %v4663_v22, %v4042_v23  ;;  %2889 = vmatpush.bf16.msrb.mxu3 %v4729_v14  ;;  %v4725_v22 = vld [vmem:[%s5132_s5 + $0x18] sm:$0xff] }
 0x156   :  { %v4737_v23 = vld [vmem:[%s5132_s5 + $0x78] sm:$0xff] }
 0x157   :  { %v1584_v39 = vpop.f32.mrf.mxu3  ;;  %2548 = vmatpush.bf16.msrb.mxu2 %v4057_v31  ;;  %v1612_v28 = vpop.f32.mrf.mxu0  ;;  %v4026_v31 = vld [vmem:[#allocation4 + $0x218] sm:$0xf0]  ;;  %2902 = vmatpush.bf16.msrb.mxu1 %v4737_v23 }
 0x158   :  { %v1585_v40 = vadd.f32 %v1584_v39, %v1572_v33  ;;  %v1597_v41 = vpop.f32.mrf.mxu2  ;;  %v4152_v39 = vld [vmem:[#allocation4 + $0x308] sm:$0xf]  ;;  %v4253_v28 = vor.u32 %v4715_v10, %v4250_v6 }
 0x159   :  { %v4731_v10 = vld [vmem:[%s5132_s5 + $0x48] sm:$0xff] }
 0x15a   :  { %v1598_v16 = vadd.f32 %v1597_v41, %v1585_v40  ;;  %v4693_v40 = vld [vmem:[#allocation4 + $0x314] sm:$0xf0]  ;;  %v4743_v6 = vld [vmem:[%s5132_s5 + $0xa8] sm:$0xff] }
 0x15b   :  { %2549 = vmatpush.bf16.msrb.mxu2 %v4041_v42  ;;  %v1623_v49 = vpop.f32.mrf.mxu1  ;;  %v4719_v42 = vld [vmem:[#allocation4 + $0x3ec] sm:$0xf]  ;;  %v4153_v7 = vor.u32 %v4693_v40, %v4152_v39 }
 0x15c   :  { %v1611_v44 = vadd.f32 %v1610_v2, %v1598_v16  ;;  %v4659_v2 = vld [vmem:[#allocation4 + $0x20c] sm:$0xf]  ;;  %v4269_v16 = vor.u32 %v4719_v42, %v4266_v43  ;;  %v4744_v42 = vld [vmem:[%s5132_s5 + $0xb0] sm:$0xff] }
 0x15d   :  { %v4029_v33 = vor.u32 %v4659_v2, %v4026_v31  ;;  %v4722_v2 = vld [vmem:[%s5132_s5] sm:$0xff] }
 0x15e   :  { %v1624_v52 = vadd.f32 %v1623_v49, %v1611_v44  ;;  %v4711_v44 = vld [vmem:[#allocation4 + $0x3ac] sm:$0xf]  ;;  %v4734_v31 = vld [vmem:[%s5132_s5 + $0x60] sm:$0xff] }
 0x15f   :  { %v1586_v53 = vpop.f32.mrf.mxu3  ;;  %2550 = vmatpush.bf16.msrb.mxu2 %v4025_v47  ;;  %v4234_v47 = vld [vmem:[#allocation4 + $0x3b8] sm:$0xf0]  ;;  %v4707_v49 = vld [vmem:[#allocation4 + $0x38c] sm:$0xf] }
 0x160   :  { %v1599_v30 = vpop.f32.mrf.mxu2  ;;  %v1630_v56 = vmax.f32 %v1624_v52, 0.0  ;;  %v1765_v52 = vperm.slane %v5006_v57, 0  ;;  %v4703_v53 = vld [vmem:[#allocation4 + $0x36c] sm:$0xf] }
 0x161   :  { %v4205_v54 = vor.u32 %v4703_v53, %v4202_v25  ;;  %v4739_v53 = vld [vmem:[%s5132_s5 + $0x88] sm:$0xff] }
 0x162   :  { %v4996_v34 = vpack.c.bf16 %v1630_v56, %v1630_v56  ;;  %2551 = vmatmul.bf16.vlgmr.msrb.gmra.mxu2 %v4988_v61  ;;  %v4699_v56 = vld [vmem:[#allocation4 + $0x34c] sm:$0xf] }
 0x163   :  { %2595 = vmatpush.bf16.msra.mxu2 %v4141_v48  ;;  %v1625_v3 = vpop.f32.mrf.mxu1  ;;  %v4237_v48 = vor.u32 %v4711_v44, %v4234_v47  ;;  %v4730_v44 = vld [vmem:[%s5132_s5 + $0x40] sm:$0xff] }
 0x164   :  { %2460 = vmatmul.bf16.vlgmr.msrb.gmra.mxu0 %v4996_v34  ;;  %v4742_v47 = vld [vmem:[%s5132_s5 + $0xa0] sm:$0xff] }
 0x165   :  { %2556 = vmatpush.bf16.msrb.mxu0 %v4265_v58 }
 0x167   :  { %2596 = vmatpush.bf16.msra.mxu2 %v4125_v35  ;;  %v4186_v35 = vld [vmem:[#allocation4 + $0x358] sm:$0xf0] }
 0x168   :  { %v4189_v63 = vor.u32 %v4699_v56, %v4186_v35  ;;  %v4738_v56 = vld [vmem:[%s5132_s5 + $0x80] sm:$0xff]  ;;  %v4753_v35 = vld [vmem:[%s5132_s5 + $0xf8] sm:$0xff] }
 0x169   :  { %2557 = vmatpush.bf16.msrb.mxu0 %v4249_v4  ;;  %v4691_v4 = vld [vmem:[#allocation4 + $0x30c] sm:$0xf] }
 0x16a   :  { %v4157_v8 = vor.u32 %v4691_v4, %v4154_v5 }
 0x16b   :  { %2597 = vmatpush.bf16.msra.mxu2 %v4109_v1  ;;  %v4170_v1 = vld [vmem:[#allocation4 + $0x338] sm:$0xf0] }
 0x16c   :  { %v4173_v3 = vor.u32 %v4695_v0, %v4170_v1  ;;  %v4751_v0 = vld [vmem:[%s5132_s5 + $0xe8] sm:$0xff] }
 0x16d   :  { %2558 = vmatpush.bf16.msrb.mxu0 %v4233_v11 }
 0x16f   :  { %2598 = vmatpush.bf16.msra.mxu2 %v4093_v9  ;;  %v1766_v9 = vperm.slane %v5006_v57, 1 }
 0x171   :  { %2559 = vmatpush.bf16.msrb.mxu0 %v4217_v45  ;;  %v4728_v45 = vld [vmem:[%s5132_s5 + $0x30] sm:$0xff] }
 0x172   :  { %2890 = vmatpush.bf16.msrb.mxu3 %v4728_v45 }
 0x173   :  { %2599 = vmatpush.bf16.msra.mxu2 %v4077_v55  ;;  %v1767_v55 = vperm.slane %v5006_v57, 2  ;;  %v4740_v57 = vld [vmem:[%s5132_s5 + $0x90] sm:$0xff] }
 0x174   :  { %2512 = vmatmul.bf16.vlgmr.msra.gmra.mxu0 %v4996_v34 }
 0x175   :  { %2560 = vmatpush.bf16.msrb.mxu0 %v4201_v21 }
 0x176   :  { %2891 = vmatpush.bf16.msrb.mxu3 %v4727_v18 }
 0x177   :  { %v2422_v27 = vpop.f32.mrf.mxu3  ;;  %2600 = vmatpush.bf16.msra.mxu2 %v4061_v20  ;;  %v4726_v20 = vld [vmem:[%s5132_s5 + $0x20] sm:$0xff] }
 0x178   :  { %v2423_v30 = vadd.f32 %v2422_v27, %v1765_v52  ;;  %v4736_v27 = vld [vmem:[%s5132_s5 + $0x70] sm:$0xff] }
 0x179   :  { %2561 = vmatpush.bf16.msrb.mxu0 %v4185_v38  ;;  %2903 = vmatpush.bf16.msrb.mxu1 %v4736_v27  ;;  %v4735_v38 = vld [vmem:[%s5132_s5 + $0x68] sm:$0xff] }
 0x17a   :  { %2892 = vmatpush.bf16.msrb.mxu3 %v4726_v20 }
 0x17b   :  { %2601 = vmatpush.bf16.msra.mxu2 %v4045_v51  ;;  %v4723_v51 = vld [vmem:[%s5132_s5 + $0x8] sm:$0xff] }
 0x17d   :  { %2562 = vmatpush.bf16.msrb.mxu0 %v4169_v36  ;;  %2904 = vmatpush.bf16.msrb.mxu1 %v4735_v38  ;;  %v4745_v36 = vld [vmem:[%s5132_s5 + $0xb8] sm:$0xff] }
 0x17e   :  { %2893 = vmatpush.bf16.msrb.mxu3 %v4725_v22 }
 0x17f   :  { %v2424_v41 = vpop.f32.mrf.mxu3  ;;  %2602 = vmatpush.bf16.msra.mxu2 %v4029_v33  ;;  %v4733_v33 = vld [vmem:[%s5132_s5 + $0x58] sm:$0xff] }
 0x180   :  { %v4732_v41 = vld [vmem:[%s5132_s5 + $0x50] sm:$0xff] }
 0x181   :  { %2563 = vmatpush.bf16.msrb.mxu0 %v4153_v7  ;;  %2905 = vmatpush.bf16.msrb.mxu1 %v4734_v31 }
 0x182   :  { %2603 = vmatmul.bf16.vlgmr.msra.gmra.mxu2 %v4988_v61  ;;  %v4221_v61 = vor.u32 %v4707_v49, %v4218_v50  ;;  %2894 = vmatpush.bf16.msrb.mxu3 %v4724_v26  ;;  %v4741_v50 = vld [vmem:[%s5132_s5 + $0x98] sm:$0xff] }
 0x183   :  { %2915 = vmatpush.bf16.msrb.mxu2 %v4745_v36 }
 0x184   :  { %2564 = vmatmul.bf16.vlgmr.msrb.gmra.mxu0 %v4996_v34 }
 0x185   :  { %2608 = vmatpush.bf16.msra.mxu0 %v4269_v16  ;;  %2906 = vmatpush.bf16.msrb.mxu1 %v4733_v33 }
 0x186   :  { %2895 = vmatpush.bf16.msrb.mxu3 %v4723_v51 }
 0x187   :  { %v2435_v58 = vpop.f32.mrf.mxu1  ;;  %2916 = vmatpush.bf16.msrb.mxu2 %v4744_v42 }
 0x188   :  { %v5009_v60 = vadd.f32 %v2435_v58, %v2423_v30 }
 0x189   :  { %2609 = vmatpush.bf16.msra.mxu0 %v4253_v28  ;;  %2907 = vmatpush.bf16.msrb.mxu1 %v4732_v41 }
 0x18a   :  { %2896 = vmatpush.bf16.msrb.mxu3 %v4722_v2 }
 0x18b   :  { %2917 = vmatpush.bf16.msrb.mxu2 %v4743_v6 }
 0x18d   :  { %2610 = vmatpush.bf16.msra.mxu0 %v4237_v48  ;;  %2908 = vmatpush.bf16.msrb.mxu1 %v4731_v10 }
 0x18f   :  { %v2437_v46 = vpop.f32.mrf.mxu1  ;;  %2918 = vmatpush.bf16.msrb.mxu2 %v4742_v47 }
 0x191   :  { %2611 = vmatpush.bf16.msra.mxu0 %v4221_v61  ;;  %2909 = vmatpush.bf16.msrb.mxu1 %v4730_v44 }
 0x193   :  { %2919 = vmatpush.bf16.msrb.mxu2 %v4741_v50 }
 0x195   :  { %2612 = vmatpush.bf16.msra.mxu0 %v4205_v54 }
 0x197   :  { %v2474_v59 = vpop.f32.mrf.mxu3  ;;  %v2487_v12 = vpop.f32.mrf.mxu1  ;;  %2920 = vmatpush.bf16.msrb.mxu2 %v4740_v57 }
 0x198   :  { %v2475_v11 = vadd.f32 %v2474_v59, %v1766_v9 }
 0x199   :  { %2613 = vmatpush.bf16.msra.mxu0 %v4189_v63 }
 0x19a   :  { %v5012_v13 = vadd.f32 %v2487_v12, %v2475_v11  ;;  %v4748_v11 = vld [vmem:[%s5132_s5 + $0xd0] sm:$0xff] }
 0x19b   :  { %2921 = vmatpush.bf16.msrb.mxu2 %v4739_v53 }
 0x19d   :  { %2614 = vmatpush.bf16.msra.mxu0 %v4173_v3  ;;  %v4750_v3 = vld [vmem:[%s5132_s5 + $0xe0] sm:$0xff] }
 0x19f   :  { %v2476_v37 = vpop.f32.mrf.mxu3  ;;  %v2489_v15 = vpop.f32.mrf.mxu1  ;;  %2922 = vmatpush.bf16.msrb.mxu2 %v4738_v56 }
 0x1a0   :  { %v4749_v37 = vld [vmem:[%s5132_s5 + $0xd8] sm:$0xff]  ;;  %v4746_v15 = vld [vmem:[%s5132_s5 + $0xc0] sm:$0xff] }
 0x1a1   :  { %2615 = vmatpush.bf16.msra.mxu0 %v4157_v8 }
 0x1a4   :  { %2616 = vmatmul.bf16.vlgmr.msra.gmra.mxu0 %v4996_v34 }
 0x1a5   :  { %2928 = vmatpush.bf16.msrb.mxu0 %v4753_v35 }
 0x1af   :  { %v2539_v34 = vpop.f32.mrf.mxu1 }
 0x1b7   :  { %v2526_v17 = vpop.f32.mrf.mxu3  ;;  %v2541_v24 = vpop.f32.mrf.mxu1 }
 0x1b8   :  { %v2527_v62 = vadd.f32 %v2526_v17, %v1767_v55 }
 0x1ba   :  { %v5025_v19 = vadd.f32 %v2539_v34, %v2527_v62 }
 0x1bf   :  { %v2528_v21 = vpop.f32.mrf.mxu3 }
 0x1c3   :  { %v2448_v29 = vpop.f32.mrf.mxu2 }
 0x1c4   :  { %v2449_v52 = vadd.f32 %v2448_v29, %v5009_v60  ;;  %v4752_v60 = vld [vmem:[%s5132_s5 + $0xf0] sm:$0xff] }
 0x1c5   :  { %2929 = vmatpush.bf16.msrb.mxu0 %v4752_v60 }
 0x1c9   :  { %2930 = vmatpush.bf16.msrb.mxu0 %v4751_v0 }
 0x1cb   :  { %v2450_v7 = vpop.f32.mrf.mxu2 }
 0x1cd   :  { %2931 = vmatpush.bf16.msrb.mxu0 %v4750_v3 }
 0x1cf   :  { %v2591_v43 = vpop.f32.mrf.mxu1 }
 0x1d1   :  { %2932 = vmatpush.bf16.msrb.mxu0 %v4749_v37 }
 0x1d3   :  { %v2500_v49 = vpop.f32.mrf.mxu2 }
 0x1d4   :  { %v2501_v4 = vadd.f32 %v2500_v49, %v5012_v13  ;;  %v4747_v13 = vld [vmem:[%s5132_s5 + $0xc8] sm:$0xff] }
 0x1d5   :  { %2933 = vmatpush.bf16.msrb.mxu0 %v4748_v11 }
 0x1d7   :  { %v2578_v39 = vpop.f32.mrf.mxu3  ;;  %v2593_v48 = vpop.f32.mrf.mxu1 }
 0x1d8   :  { %v2579_v40 = vadd.f32 %v2578_v39, %v1768_v32  ;;  %v4758_v32 = vld [vmem:[%s5133_s6] ss:$0 sm:$0xff] }
 0x1d9   :  { %2934 = vmatpush.bf16.msrb.mxu0 %v4747_v13 }
 0x1da   :  { %v5067_v16 = vadd.f32 %v2591_v43, %v2579_v40 }
 0x1db   :  { %v2502_v61 = vpop.f32.mrf.mxu2 }
 0x1dd   :  { %2935 = vmatpush.bf16.msrb.mxu0 %v4746_v15 }
 0x1df   :  { %v2580_v28 = vpop.f32.mrf.mxu3 }
 0x1e1   :  { %v2461_v25 = vpop.f32.mrf.mxu0 }
 0x1e2   :  { %v2462_v54 = vadd.f32 %v2461_v25, %v2449_v52 }
 0x1e4   :  { %v2621_v30 = vmax.f32 %v2462_v54, 0.0 }
 0x1e5   :  { %v2552_v58 = vpop.f32.mrf.mxu2 }
 0x1e6   :  { %v2625_v59 = vpack.c.bf16 %v2621_v30, %v2621_v30  ;;  %v2553_v14 = vadd.f32 %v2552_v58, %v5025_v19 }
 0x1e8   :  { %2897 = vmatmul.bf16.vlgmr.msrb.gmra.mxu3 %v2625_v59 }
 0x1e9   :  { %v2463_v63 = vpop.f32.mrf.mxu0 }
 0x1ed   :  { %v2554_v1 = vpop.f32.mrf.mxu2 }
 0x1f1   :  { %v2513_v5 = vpop.f32.mrf.mxu0 }
 0x1f2   :  { %v2514_v46 = vadd.f32 %v2513_v5, %v2501_v4 }
 0x1f4   :  { %v2622_v8 = vmax.f32 %v2514_v46, 0.0 }
 0x1f6   :  { %v2626_v9 = vpack.c.bf16 %v2622_v8, %v2622_v8 }
 0x1f8   :  { %2910 = vmatmul.bf16.vlgmr.msrb.gmra.mxu1 %v2626_v9 }
 0x1f9   :  { %v2515_v12 = vpop.f32.mrf.mxu0 }
 0x201   :  { %v2565_v55 = vpop.f32.mrf.mxu0 }
 0x202   :  { %v2566_v45 = vadd.f32 %v2565_v55, %v2553_v14 }
 0x204   :  { %v2623_v62 = vmax.f32 %v2566_v45, 0.0 }
 0x205   :  { %v2604_v17 = vpop.f32.mrf.mxu2 }
 0x206   :  { %v2627_v18 = vpack.c.bf16 %v2623_v62, %v2623_v62  ;;  %v2605_v21 = vadd.f32 %v2604_v17, %v5067_v16 }
 0x208   :  { %2923 = vmatmul.bf16.vlgmr.msrb.gmra.mxu2 %v2627_v18 }
 0x209   :  { %v2567_v34 = vpop.f32.mrf.mxu0 }
 0x20d   :  { %v2606_v20 = vpop.f32.mrf.mxu2 }
 0x221   :  { %v2617_v22 = vpop.f32.mrf.mxu0 }
 0x222   :  { %v2618_v23 = vadd.f32 %v2617_v22, %v2605_v21 }
 0x224   :  { %v2624_v24 = vmax.f32 %v2618_v23, 0.0 }
 0x226   :  { %v2628_v26 = vpack.c.bf16 %v2624_v24, %v2624_v24 }
 0x228   :  { %2936 = vmatmul.bf16.vlgmr.msrb.gmra.mxu0 %v2628_v26 }
 0x229   :  { %v2619_v19 = vpop.f32.mrf.mxu0 }
 0x26b   :  { %v2898_v27 = vpop.f32.mrf.mxu3 }
 0x26c   :  { %v2899_v33 = vadd.f32 %v4758_v32, %v2898_v27 }
 0x273   :  { %v2900_v51 = vpop.f32.mrf.mxu3 }
 0x275   :  { %v2911_v38 = vpop.f32.mrf.mxu1 }
 0x276   :  { %v2912_v36 = vadd.f32 %v2911_v38, %v2899_v33 }
 0x27d   :  { %v2913_v2 = vpop.f32.mrf.mxu1 }
 0x28b   :  { %v2924_v31 = vpop.f32.mrf.mxu2 }
 0x28c   :  { %v2925_v39 = vadd.f32 %v2924_v31, %v2912_v36 }
 0x293   :  { %v2926_v29 = vpop.f32.mrf.mxu2 }
 0x2a5   :  { %v2937_v40 = vpop.f32.mrf.mxu0 }
 0x2a6   :  { %v2938_v41 = vadd.f32 %v2937_v40, %v2925_v39 }
 0x2a8   :  { %2941 = vmax.xlane.f32.xlu0 %v2938_v41 }
 0x2ad   :  { %v2939_v42 = vpop.f32.mrf.mxu0 }
 0x31b   :  { %v2942_v43 = vpop.xlane.xlu0 %2941 }
 0x31c   :  { %v2943_v7 = vsub.f32 %v2938_v41, %v2942_v43 }
 0x31e   :  { %v2944_v16 = vmul.f32 1.442695, %v2943_v7 }
 0x320   :  { %4759 = vpow2.f32 %v2944_v16 }
 0x326   :  { %v4760_v10 = vpop.eup %4759 }
 0x327   :  { %2946 = vadd.xlane.f32.xlu0 %v4760_v10 }
 0x39a   :  { %v2947_v6 = vpop.xlane.xlu0 %2946 }
 0x39b   :  { %4761 = vrcp.f32 %v2947_v6  ;;  %v2959_v48 = vand.u32 2147483648, %v2947_v6  ;;  %v2957_v50 = vand.u32 2147483647, %v2947_v6  ;;  %vm2953_vm2 = vweird.f32 %v2947_v6 }
 0x39d   :  { %v2960_v61 = vor.u32 1.1754944e-38, %v2959_v48  ;;  %vm2958_vm4 = vcmp.eq.f32.partialorder %v2957_v50, 8.507059e+37 }
 0x3a1   :  { %v4762_v28 = vpop.eup %4761 }
 0x3a2   :  { %v2949_v44 = vmul.f32 %v4762_v28, %v2947_v6  ;;  %vm2954_vm1 = vweird.f32 %v4762_v28 }
 0x3a3   :  { %vm2955_vm3 = vmor %vm2953_vm2, %vm2954_vm1 }
 0x3a4   :  { %v2950_v47 = vsub.f32 1.0, %v2949_v44 }
 0x3a6   :  { %v2951_v49 = vmul.f32 %v4762_v28, %v2950_v47 }
 0x3a8   :  { %v2952_v57 = vadd.f32 %v4762_v28, %v2951_v49 }
 0x3aa   :  { %v2956_v52 = vsel %vm2955_vm3, %v4762_v28, %v2952_v57 }
 0x3ab   :  { %v2961_v53 = vsel %vm2958_vm4, %v2960_v61, %v2956_v52 }
 0x3ac   :  { %v2962_v25 = vmul.f32 %v4760_v10, %v2961_v53 }
 0x3ae   :  { %2963 = vst [vmem:[%s5134_s7] sm:$0xff] %v2962_v25 }
 0x3af   :  { %2968 = vsyncpa [#allocation3], 1 }
 0x3b0   :  { %2969 = vsyncpa [#allocation5], 1 }

</bundles_post_ra>
